<compile_context>
chip_gen: v7x
topology: tpu7x:2x2x1
jax: 0.10.0
libtpu: 0.0.40
codegen_flags: <defaults>
</compile_context>

<pallas_src>
from functools import partial

import jax
import jax.numpy as jnp
from jax.experimental import pallas as pl
from jax.experimental.pallas import tpu as pltpu

LANE = 128
SUBLANE = 8


def _round_up(v, m):
    return (v + m - 1) // m * m


def _bilstm_last_kernel(x_ref, wih_ref, whh_ref, bf_ref, bb_ref, out_ref,
                        *, seq_len, hidden, hidden_pad, batch_pad):
    T, Bp, H, Hp = seq_len, batch_pad, hidden, hidden_pad
    G = 4 * Hp

    # --- input projection for BOTH directions in one MXU pass (off the
    #     recurrent critical path): (T*Bp, D) @ (D, 8*Hp) -> f32
    xg = jnp.dot(x_ref[...], wih_ref[...],
                 preferred_element_type=jnp.float32)            # (T*Bp, 8Hp)

    # Fold combined biases in once, outside the serial loop.
    xg_f = xg[:, 0:G] + bf_ref[...]                             # (T*Bp, 4Hp)
    g_bwd = xg[(T - 1) * Bp:T * Bp, G:2 * G] + bb_ref[...]      # (Bp, 4Hp)

    whh = whh_ref[...]                                          # (Hp, 4Hp) bf16

    def act_slices(gates):
        # Hp == 128 -> every gate slice is vreg-aligned (no half-lane extracts).
        i = jax.nn.sigmoid(gates[:, 0 * Hp:1 * Hp])
        f = jax.nn.sigmoid(gates[:, 1 * Hp:2 * Hp])
        g = jnp.tanh(gates[:, 2 * Hp:3 * Hp])
        o = jax.nn.sigmoid(gates[:, 3 * Hp:4 * Hp])
        return i, f, g, o

    def step_from_zero(gates):
        # h_prev = c_prev = 0  =>  skip h@W_hh, skip forget gate, c = i*g.
        i = jax.nn.sigmoid(gates[:, 0 * Hp:1 * Hp])
        g = jnp.tanh(gates[:, 2 * Hp:3 * Hp])
        o = jax.nn.sigmoid(gates[:, 3 * Hp:4 * Hp])
        c = i * g
        return o * jnp.tanh(c), c

    # ---- forward direction: full recurrence t = 0 .. T-1 (static unroll)
    h, c = step_from_zero(xg_f[0:Bp, :])
    for t in range(1, T):
        gates = (xg_f[t * Bp:(t + 1) * Bp, :]
                 + jnp.dot(h.astype(jnp.bfloat16), whh,
                           preferred_element_type=jnp.float32))
        i, f, g, o = act_slices(gates)
        c = f * c + i * g
        h = o * jnp.tanh(c)

    # ---- backward direction at original index T-1: one step from zero state
    h_b, _ = step_from_zero(g_bwd)

    # Write both halves straight into the output (no lane-concat temporary).
    out_ref[:, 0:H] = h[:, 0:H].astype(out_ref.dtype)
    out_ref[:, H:2 * H] = h_b[:, 0:H].astype(out_ref.dtype)


def _pad_gate_axis(w, H, Hp):
    """(..., 4H) -> (..., 4Hp): zero-pad each of the 4 gate blocks to Hp lanes."""
    if Hp == H:
        return w
    blocks = jnp.split(w, 4, axis=-1)
    pad = [(0, 0)] * (w.ndim - 1) + [(0, Hp - H)]
    return jnp.concatenate([jnp.pad(b, pad) for b in blocks], axis=-1)


def bilstm_last(x, params):
    """x: (B, T, D) f32 -> (B, 2H) f32, equal to lstm_out[:, -1, :]."""
    B, T, D = x.shape
    H = params["whh_f"].shape[0]
    Hp = _round_up(H, LANE)      # pad each gate block to a full 128-lane vreg
    Bp = _round_up(B, SUBLANE)   # pad batch to a sublane multiple

    # Layout plumbing (in a real model the padded bf16 weights are built once
    # at load time, not per call).
    wih = jnp.concatenate(
        [_pad_gate_axis(params["wih_f"], H, Hp),
         _pad_gate_axis(params["wih_b"], H, Hp)],
        axis=-1).astype(jnp.bfloat16)                                  # (D, 8Hp)
    whh_f = jnp.pad(_pad_gate_axis(params["whh_f"], H, Hp),
                    ((0, Hp - H), (0, 0))).astype(jnp.bfloat16)        # (Hp, 4Hp)
    b_f = _pad_gate_axis(params["b_f"], H, Hp)                         # (1, 4Hp) f32
    b_b = _pad_gate_axis(params["b_b"], H, Hp)                         # (1, 4Hp) f32
    # W_hh_bwd is not needed: backward output at t=T-1 uses a zero hidden state.

    # Time-major, batch-padded, flattened input: (T*Bp, D), bf16.
    xp = jnp.pad(x, ((0, Bp - B), (0, 0), (0, 0)))
    xp = jnp.transpose(xp, (1, 0, 2)).reshape(T * Bp, D).astype(jnp.bfloat16)

    args = (xp, wih, whh_f, b_f, b_b)

    def full_spec(shape):
        nd = len(shape)
        return pl.BlockSpec(shape, lambda i, _nd=nd: (0,) * _nd)

    kernel = partial(_bilstm_last_kernel, seq_len=T, hidden=H,
                     hidden_pad=Hp, batch_pad=Bp)
    out = pl.pallas_call(
        kernel,
        out_shape=jax.ShapeDtypeStruct((Bp, 2 * H), jnp.float32),
        grid=(1,),
        in_specs=[full_spec(a.shape) for a in args],
        out_specs=full_spec((Bp, 2 * H)),
        compiler_params=pltpu.CompilerParams(
            dimension_semantics=("arbitrary",)),
    )(*args)
    return out[:B]


def init_params(key, input_dim, hidden_dim):
    """Deterministic synthetic init matching torch.nn.LSTM U(-1/sqrt(H), 1/sqrt(H)).
    Stored transposed vs. PyTorch ((D,4H)/(H,4H)); gate order (i, f, g, o);
    biases pre-combined (b_ih + b_hh)."""
    k = 1.0 / jnp.sqrt(jnp.float32(hidden_dim))
    keys = jax.random.split(key, 8)

    def u(kk, shape):
        return jax.random.uniform(kk, shape, jnp.float32, -k, k)

    return {
        "wih_f": u(keys[0], (input_dim, 4 * hidden_dim)),
        "whh_f": u(keys[1], (hidden_dim, 4 * hidden_dim)),
        "b_f":   (u(keys[2], (1, 4 * hidden_dim)) + u(keys[3], (1, 4 * hidden_dim))),
        "wih_b": u(keys[4], (input_dim, 4 * hidden_dim)),
        "whh_b": u(keys[5], (hidden_dim, 4 * hidden_dim)),
        "b_b":   (u(keys[6], (1, 4 * hidden_dim)) + u(keys[7], (1, 4 * hidden_dim))),
    }


def _reference_bilstm_last(x, params):
    """Pure-JAX reference with the same bf16 operand rounding as the kernel
    (f32 accumulation), so it isolates structural/scan-order correctness."""
    B, T, D = x.shape
    H = params["whh_f"].shape[0]
    r = lambda a: a.astype(jnp.bfloat16).astype(jnp.float32)

    xr = r(x)
    wih_f, whh_f = r(params["wih_f"]), r(params["whh_f"])
    wih_b, whh_b = r(params["wih_b"]), r(params["whh_b"])
    b_f, b_b = params["b_f"], params["b_b"]

    def cell(x_t, h, c, wih, whh, b):
        g = x_t @ wih + r(h) @ whh + b
        i = jax.nn.sigmoid(g[:, 0 * H:1 * H])
        f = jax.nn.sigmoid(g[:, 1 * H:2 * H])
        gg = jnp.tanh(g[:, 2 * H:3 * H])
        o = jax.nn.sigmoid(g[:, 3 * H:4 * H])
        c = f * c + i * gg
        h = o * jnp.tanh(c)
        return h, c

    h_f = jnp.zeros((B, H), jnp.float32)
    c_f = jnp.zeros((B, H), jnp.float32)
    for t in range(T):
        h_f, c_f = cell(xr[:, t, :], h_f, c_f, wih_f, whh_f, b_f)
    h_b, _ = cell(xr[:, T - 1, :],
                  jnp.zeros((B, H), jnp.float32), jnp.zeros((B, H), jnp.float32),
                  wih_b, whh_b, b_b)
    return jnp.concatenate([h_f, h_b], axis=-1)


if __name__ == "__main__":
    B, T, D, H = 2, 8, 32, 64   # batch, seq, input_dim, hidden_dim (module defaults)

    key = jax.random.PRNGKey(0)
    kx, kp = jax.random.split(key)
    x = jax.random.normal(kx, (B, T, D), jnp.float32)
    params = init_params(kp, D, H)

    out = bilstm_last(x, params)
    out = jax.block_until_ready(out)

    ref = _reference_bilstm_last(x, params)
    assert out.shape == (B, 2 * H)
    # bf16 operand rounding + minor transcendental/accumulation-order deltas.
    assert jnp.allclose(out, ref, atol=1e-3, rtol=1e-3)

    print("KERNEL_OK")
</pallas_src>

<mosaic_0001>
module attributes {stable_mosaic.version = 11 : i64} {
  func.func @_bilstm_last_kernel(%arg0: i32, %arg1: memref<64x32xbf16, #tpu.memory_space<vmem>>, %arg2: memref<32x1024xbf16, #tpu.memory_space<vmem>>, %arg3: memref<128x512xbf16, #tpu.memory_space<vmem>>, %arg4: memref<1x512xf32, #tpu.memory_space<vmem>>, %arg5: memref<1x512xf32, #tpu.memory_space<vmem>>, %arg6: memref<8x128xf32, #tpu.memory_space<vmem>>) attributes {dimension_semantics = [#tpu.dimension_semantics<arbitrary>], iteration_bounds = array<i64: 1>, scalar_prefetch = 0 : i64, scratch_operands = 0 : i64, tpu.core_type = #tpu.core_type<tc>, window_params = [{pipeline_mode = #tpu.pipeline_mode<synchronous>, transform_indices = @transform_0, window_bounds = array<i64: 64, 32>}, {pipeline_mode = #tpu.pipeline_mode<synchronous>, transform_indices = @transform_1, window_bounds = array<i64: 32, 1024>}, {pipeline_mode = #tpu.pipeline_mode<synchronous>, transform_indices = @transform_2, window_bounds = array<i64: 128, 512>}, {pipeline_mode = #tpu.pipeline_mode<synchronous>, transform_indices = @transform_3, window_bounds = array<i64: 1, 512>}, {pipeline_mode = #tpu.pipeline_mode<synchronous>, transform_indices = @transform_4, window_bounds = array<i64: 1, 512>}, {pipeline_mode = #tpu.pipeline_mode<synchronous>, transform_indices = @transform_5, window_bounds = array<i64: 8, 128>}]} {
    %c0 = arith.constant 0 : index
    %c0_0 = arith.constant 0 : index
    %0 = vector.load %arg1[%c0, %c0_0] : memref<64x32xbf16, #tpu.memory_space<vmem>>, vector<64x32xbf16>
    %c0_1 = arith.constant 0 : index
    %c0_2 = arith.constant 0 : index
    %1 = vector.load %arg2[%c0_1, %c0_2] : memref<32x1024xbf16, #tpu.memory_space<vmem>>, vector<32x1024xbf16>
    %cst = arith.constant dense<0.000000e+00> : vector<64x1024xf32>
    %2 = tpu.matmul %0, %1, %cst {dimension_numbers = #tpu.dot_dimension_numbers<[1], [0], [0], [1], [0, 0, 1, 1], [], []>} : vector<64x32xbf16>, vector<32x1024xbf16>, vector<64x1024xf32> -> vector<64x1024xf32>
    %3 = vector.extract_strided_slice %2 {offsets = [0, 0], sizes = [64, 512], strides = [1, 1]} : vector<64x1024xf32> to vector<64x512xf32>
    %c0_3 = arith.constant 0 : index
    %c0_4 = arith.constant 0 : index
    %4 = vector.load %arg4[%c0_3, %c0_4] : memref<1x512xf32, #tpu.memory_space<vmem>>, vector<1x512xf32>
    %5 = vector.broadcast %4 : vector<1x512xf32> to vector<64x512xf32>
    %6 = arith.addf %3, %5 : vector<64x512xf32>
    %7 = vector.extract_strided_slice %2 {offsets = [56, 512], sizes = [8, 512], strides = [1, 1]} : vector<64x1024xf32> to vector<8x512xf32>
    %c0_5 = arith.constant 0 : index
    %c0_6 = arith.constant 0 : index
    %8 = vector.load %arg5[%c0_5, %c0_6] : memref<1x512xf32, #tpu.memory_space<vmem>>, vector<1x512xf32>
    %9 = vector.broadcast %8 : vector<1x512xf32> to vector<8x512xf32>
    %10 = arith.addf %7, %9 : vector<8x512xf32>
    %c0_7 = arith.constant 0 : index
    %c0_8 = arith.constant 0 : index
    %11 = vector.load %arg3[%c0_7, %c0_8] : memref<128x512xbf16, #tpu.memory_space<vmem>>, vector<128x512xbf16>
    %12 = vector.extract_strided_slice %6 {offsets = [0, 0], sizes = [8, 512], strides = [1, 1]} : vector<64x512xf32> to vector<8x512xf32>
    %13 = vector.extract_strided_slice %12 {offsets = [0, 0], sizes = [8, 128], strides = [1, 1]} : vector<8x512xf32> to vector<8x128xf32>
    %14 = arith.negf %13 : vector<8x128xf32>
    %15 = math.exp %14 : vector<8x128xf32>
    %cst_9 = arith.constant 1.000000e+00 : f32
    %16 = vector.broadcast %cst_9 : f32 to vector<8x128xf32>
    %17 = arith.addf %16, %15 : vector<8x128xf32>
    %18 = arith.divf %16, %17 : vector<8x128xf32>
    %19 = vector.extract_strided_slice %12 {offsets = [0, 256], sizes = [8, 128], strides = [1, 1]} : vector<8x512xf32> to vector<8x128xf32>
    %20 = math.tanh %19 : vector<8x128xf32>
    %21 = vector.extract_strided_slice %12 {offsets = [0, 384], sizes = [8, 128], strides = [1, 1]} : vector<8x512xf32> to vector<8x128xf32>
    %22 = arith.negf %21 : vector<8x128xf32>
    %23 = math.exp %22 : vector<8x128xf32>
    %cst_10 = arith.constant 1.000000e+00 : f32
    %24 = vector.broadcast %cst_10 : f32 to vector<8x128xf32>
    %25 = arith.addf %24, %23 : vector<8x128xf32>
    %26 = arith.divf %24, %25 : vector<8x128xf32>
    %27 = arith.mulf %18, %20 : vector<8x128xf32>
    %28 = math.tanh %27 : vector<8x128xf32>
    %29 = arith.mulf %26, %28 : vector<8x128xf32>
    %30 = vector.extract_strided_slice %6 {offsets = [8, 0], sizes = [8, 512], strides = [1, 1]} : vector<64x512xf32> to vector<8x512xf32>
    %31 = arith.truncf %29 : vector<8x128xf32> to vector<8x128xbf16>
    %cst_11 = arith.constant dense<0.000000e+00> : vector<8x512xf32>
    %32 = tpu.matmul %31, %11, %cst_11 {dimension_numbers = #tpu.dot_dimension_numbers<[1], [0], [0], [1], [0, 0, 1, 1], [], []>} : vector<8x128xbf16>, vector<128x512xbf16>, vector<8x512xf32> -> vector<8x512xf32>
    %33 = arith.addf %30, %32 : vector<8x512xf32>
    %34 = vector.extract_strided_slice %33 {offsets = [0, 0], sizes = [8, 128], strides = [1, 1]} : vector<8x512xf32> to vector<8x128xf32>
    %35 = arith.negf %34 : vector<8x128xf32>
    %36 = math.exp %35 : vector<8x128xf32>
    %cst_12 = arith.constant 1.000000e+00 : f32
    %37 = vector.broadcast %cst_12 : f32 to vector<8x128xf32>
    %38 = arith.addf %37, %36 : vector<8x128xf32>
    %39 = arith.divf %37, %38 : vector<8x128xf32>
    %40 = vector.extract_strided_slice %33 {offsets = [0, 128], sizes = [8, 128], strides = [1, 1]} : vector<8x512xf32> to vector<8x128xf32>
    %41 = arith.negf %40 : vector<8x128xf32>
    %42 = math.exp %41 : vector<8x128xf32>
    %cst_13 = arith.constant 1.000000e+00 : f32
    %43 = vector.broadcast %cst_13 : f32 to vector<8x128xf32>
    %44 = arith.addf %43, %42 : vector<8x128xf32>
    %45 = arith.divf %43, %44 : vector<8x128xf32>
    %46 = vector.extract_strided_slice %33 {offsets = [0, 256], sizes = [8, 128], strides = [1, 1]} : vector<8x512xf32> to vector<8x128xf32>
    %47 = math.tanh %46 : vector<8x128xf32>
    %48 = vector.extract_strided_slice %33 {offsets = [0, 384], sizes = [8, 128], strides = [1, 1]} : vector<8x512xf32> to vector<8x128xf32>
    %49 = arith.negf %48 : vector<8x128xf32>
    %50 = math.exp %49 : vector<8x128xf32>
    %cst_14 = arith.constant 1.000000e+00 : f32
    %51 = vector.broadcast %cst_14 : f32 to vector<8x128xf32>
    %52 = arith.addf %51, %50 : vector<8x128xf32>
    %53 = arith.divf %51, %52 : vector<8x128xf32>
    %54 = arith.mulf %45, %27 : vector<8x128xf32>
    %55 = arith.mulf %39, %47 : vector<8x128xf32>
    %56 = arith.addf %54, %55 : vector<8x128xf32>
    %57 = math.tanh %56 : vector<8x128xf32>
    %58 = arith.mulf %53, %57 : vector<8x128xf32>
    %59 = vector.extract_strided_slice %6 {offsets = [16, 0], sizes = [8, 512], strides = [1, 1]} : vector<64x512xf32> to vector<8x512xf32>
    %60 = arith.truncf %58 : vector<8x128xf32> to vector<8x128xbf16>
    %cst_15 = arith.constant dense<0.000000e+00> : vector<8x512xf32>
    %61 = tpu.matmul %60, %11, %cst_15 {dimension_numbers = #tpu.dot_dimension_numbers<[1], [0], [0], [1], [0, 0, 1, 1], [], []>} : vector<8x128xbf16>, vector<128x512xbf16>, vector<8x512xf32> -> vector<8x512xf32>
    %62 = arith.addf %59, %61 : vector<8x512xf32>
    %63 = vector.extract_strided_slice %62 {offsets = [0, 0], sizes = [8, 128], strides = [1, 1]} : vector<8x512xf32> to vector<8x128xf32>
    %64 = arith.negf %63 : vector<8x128xf32>
    %65 = math.exp %64 : vector<8x128xf32>
    %cst_16 = arith.constant 1.000000e+00 : f32
    %66 = vector.broadcast %cst_16 : f32 to vector<8x128xf32>
    %67 = arith.addf %66, %65 : vector<8x128xf32>
    %68 = arith.divf %66, %67 : vector<8x128xf32>
    %69 = vector.extract_strided_slice %62 {offsets = [0, 128], sizes = [8, 128], strides = [1, 1]} : vector<8x512xf32> to vector<8x128xf32>
    %70 = arith.negf %69 : vector<8x128xf32>
    %71 = math.exp %70 : vector<8x128xf32>
    %cst_17 = arith.constant 1.000000e+00 : f32
    %72 = vector.broadcast %cst_17 : f32 to vector<8x128xf32>
    %73 = arith.addf %72, %71 : vector<8x128xf32>
    %74 = arith.divf %72, %73 : vector<8x128xf32>
    %75 = vector.extract_strided_slice %62 {offsets = [0, 256], sizes = [8, 128], strides = [1, 1]} : vector<8x512xf32> to vector<8x128xf32>
    %76 = math.tanh %75 : vector<8x128xf32>
    %77 = vector.extract_strided_slice %62 {offsets = [0, 384], sizes = [8, 128], strides = [1, 1]} : vector<8x512xf32> to vector<8x128xf32>
    %78 = arith.negf %77 : vector<8x128xf32>
    %79 = math.exp %78 : vector<8x128xf32>
    %cst_18 = arith.constant 1.000000e+00 : f32
    %80 = vector.broadcast %cst_18 : f32 to vector<8x128xf32>
    %81 = arith.addf %80, %79 : vector<8x128xf32>
    %82 = arith.divf %80, %81 : vector<8x128xf32>
    %83 = arith.mulf %74, %56 : vector<8x128xf32>
    %84 = arith.mulf %68, %76 : vector<8x128xf32>
    %85 = arith.addf %83, %84 : vector<8x128xf32>
    %86 = math.tanh %85 : vector<8x128xf32>
    %87 = arith.mulf %82, %86 : vector<8x128xf32>
    %88 = vector.extract_strided_slice %6 {offsets = [24, 0], sizes = [8, 512], strides = [1, 1]} : vector<64x512xf32> to vector<8x512xf32>
    %89 = arith.truncf %87 : vector<8x128xf32> to vector<8x128xbf16>
    %cst_19 = arith.constant dense<0.000000e+00> : vector<8x512xf32>
    %90 = tpu.matmul %89, %11, %cst_19 {dimension_numbers = #tpu.dot_dimension_numbers<[1], [0], [0], [1], [0, 0, 1, 1], [], []>} : vector<8x128xbf16>, vector<128x512xbf16>, vector<8x512xf32> -> vector<8x512xf32>
    %91 = arith.addf %88, %90 : vector<8x512xf32>
    %92 = vector.extract_strided_slice %91 {offsets = [0, 0], sizes = [8, 128], strides = [1, 1]} : vector<8x512xf32> to vector<8x128xf32>
    %93 = arith.negf %92 : vector<8x128xf32>
    %94 = math.exp %93 : vector<8x128xf32>
    %cst_20 = arith.constant 1.000000e+00 : f32
    %95 = vector.broadcast %cst_20 : f32 to vector<8x128xf32>
    %96 = arith.addf %95, %94 : vector<8x128xf32>
    %97 = arith.divf %95, %96 : vector<8x128xf32>
    %98 = vector.extract_strided_slice %91 {offsets = [0, 128], sizes = [8, 128], strides = [1, 1]} : vector<8x512xf32> to vector<8x128xf32>
    %99 = arith.negf %98 : vector<8x128xf32>
    %100 = math.exp %99 : vector<8x128xf32>
    %cst_21 = arith.constant 1.000000e+00 : f32
    %101 = vector.broadcast %cst_21 : f32 to vector<8x128xf32>
    %102 = arith.addf %101, %100 : vector<8x128xf32>
    %103 = arith.divf %101, %102 : vector<8x128xf32>
    %104 = vector.extract_strided_slice %91 {offsets = [0, 256], sizes = [8, 128], strides = [1, 1]} : vector<8x512xf32> to vector<8x128xf32>
    %105 = math.tanh %104 : vector<8x128xf32>
    %106 = vector.extract_strided_slice %91 {offsets = [0, 384], sizes = [8, 128], strides = [1, 1]} : vector<8x512xf32> to vector<8x128xf32>
    %107 = arith.negf %106 : vector<8x128xf32>
    %108 = math.exp %107 : vector<8x128xf32>
    %cst_22 = arith.constant 1.000000e+00 : f32
    %109 = vector.broadcast %cst_22 : f32 to vector<8x128xf32>
    %110 = arith.addf %109, %108 : vector<8x128xf32>
    %111 = arith.divf %109, %110 : vector<8x128xf32>
    %112 = arith.mulf %103, %85 : vector<8x128xf32>
    %113 = arith.mulf %97, %105 : vector<8x128xf32>
    %114 = arith.addf %112, %113 : vector<8x128xf32>
    %115 = math.tanh %114 : vector<8x128xf32>
    %116 = arith.mulf %111, %115 : vector<8x128xf32>
    %117 = vector.extract_strided_slice %6 {offsets = [32, 0], sizes = [8, 512], strides = [1, 1]} : vector<64x512xf32> to vector<8x512xf32>
    %118 = arith.truncf %116 : vector<8x128xf32> to vector<8x128xbf16>
    %cst_23 = arith.constant dense<0.000000e+00> : vector<8x512xf32>
    %119 = tpu.matmul %118, %11, %cst_23 {dimension_numbers = #tpu.dot_dimension_numbers<[1], [0], [0], [1], [0, 0, 1, 1], [], []>} : vector<8x128xbf16>, vector<128x512xbf16>, vector<8x512xf32> -> vector<8x512xf32>
    %120 = arith.addf %117, %119 : vector<8x512xf32>
    %121 = vector.extract_strided_slice %120 {offsets = [0, 0], sizes = [8, 128], strides = [1, 1]} : vector<8x512xf32> to vector<8x128xf32>
    %122 = arith.negf %121 : vector<8x128xf32>
    %123 = math.exp %122 : vector<8x128xf32>
    %cst_24 = arith.constant 1.000000e+00 : f32
    %124 = vector.broadcast %cst_24 : f32 to vector<8x128xf32>
    %125 = arith.addf %124, %123 : vector<8x128xf32>
    %126 = arith.divf %124, %125 : vector<8x128xf32>
    %127 = vector.extract_strided_slice %120 {offsets = [0, 128], sizes = [8, 128], strides = [1, 1]} : vector<8x512xf32> to vector<8x128xf32>
    %128 = arith.negf %127 : vector<8x128xf32>
    %129 = math.exp %128 : vector<8x128xf32>
    %cst_25 = arith.constant 1.000000e+00 : f32
    %130 = vector.broadcast %cst_25 : f32 to vector<8x128xf32>
    %131 = arith.addf %130, %129 : vector<8x128xf32>
    %132 = arith.divf %130, %131 : vector<8x128xf32>
    %133 = vector.extract_strided_slice %120 {offsets = [0, 256], sizes = [8, 128], strides = [1, 1]} : vector<8x512xf32> to vector<8x128xf32>
    %134 = math.tanh %133 : vector<8x128xf32>
    %135 = vector.extract_strided_slice %120 {offsets = [0, 384], sizes = [8, 128], strides = [1, 1]} : vector<8x512xf32> to vector<8x128xf32>
    %136 = arith.negf %135 : vector<8x128xf32>
    %137 = math.exp %136 : vector<8x128xf32>
    %cst_26 = arith.constant 1.000000e+00 : f32
    %138 = vector.broadcast %cst_26 : f32 to vector<8x128xf32>
    %139 = arith.addf %138, %137 : vector<8x128xf32>
    %140 = arith.divf %138, %139 : vector<8x128xf32>
    %141 = arith.mulf %132, %114 : vector<8x128xf32>
    %142 = arith.mulf %126, %134 : vector<8x128xf32>
    %143 = arith.addf %141, %142 : vector<8x128xf32>
    %144 = math.tanh %143 : vector<8x128xf32>
    %145 = arith.mulf %140, %144 : vector<8x128xf32>
    %146 = vector.extract_strided_slice %6 {offsets = [40, 0], sizes = [8, 512], strides = [1, 1]} : vector<64x512xf32> to vector<8x512xf32>
    %147 = arith.truncf %145 : vector<8x128xf32> to vector<8x128xbf16>
    %cst_27 = arith.constant dense<0.000000e+00> : vector<8x512xf32>
    %148 = tpu.matmul %147, %11, %cst_27 {dimension_numbers = #tpu.dot_dimension_numbers<[1], [0], [0], [1], [0, 0, 1, 1], [], []>} : vector<8x128xbf16>, vector<128x512xbf16>, vector<8x512xf32> -> vector<8x512xf32>
    %149 = arith.addf %146, %148 : vector<8x512xf32>
    %150 = vector.extract_strided_slice %149 {offsets = [0, 0], sizes = [8, 128], strides = [1, 1]} : vector<8x512xf32> to vector<8x128xf32>
    %151 = arith.negf %150 : vector<8x128xf32>
    %152 = math.exp %151 : vector<8x128xf32>
    %cst_28 = arith.constant 1.000000e+00 : f32
    %153 = vector.broadcast %cst_28 : f32 to vector<8x128xf32>
    %154 = arith.addf %153, %152 : vector<8x128xf32>
    %155 = arith.divf %153, %154 : vector<8x128xf32>
    %156 = vector.extract_strided_slice %149 {offsets = [0, 128], sizes = [8, 128], strides = [1, 1]} : vector<8x512xf32> to vector<8x128xf32>
    %157 = arith.negf %156 : vector<8x128xf32>
    %158 = math.exp %157 : vector<8x128xf32>
    %cst_29 = arith.constant 1.000000e+00 : f32
    %159 = vector.broadcast %cst_29 : f32 to vector<8x128xf32>
    %160 = arith.addf %159, %158 : vector<8x128xf32>
    %161 = arith.divf %159, %160 : vector<8x128xf32>
    %162 = vector.extract_strided_slice %149 {offsets = [0, 256], sizes = [8, 128], strides = [1, 1]} : vector<8x512xf32> to vector<8x128xf32>
    %163 = math.tanh %162 : vector<8x128xf32>
    %164 = vector.extract_strided_slice %149 {offsets = [0, 384], sizes = [8, 128], strides = [1, 1]} : vector<8x512xf32> to vector<8x128xf32>
    %165 = arith.negf %164 : vector<8x128xf32>
    %166 = math.exp %165 : vector<8x128xf32>
    %cst_30 = arith.constant 1.000000e+00 : f32
    %167 = vector.broadcast %cst_30 : f32 to vector<8x128xf32>
    %168 = arith.addf %167, %166 : vector<8x128xf32>
    %169 = arith.divf %167, %168 : vector<8x128xf32>
    %170 = arith.mulf %161, %143 : vector<8x128xf32>
    %171 = arith.mulf %155, %163 : vector<8x128xf32>
    %172 = arith.addf %170, %171 : vector<8x128xf32>
    %173 = math.tanh %172 : vector<8x128xf32>
    %174 = arith.mulf %169, %173 : vector<8x128xf32>
    %175 = vector.extract_strided_slice %6 {offsets = [48, 0], sizes = [8, 512], strides = [1, 1]} : vector<64x512xf32> to vector<8x512xf32>
    %176 = arith.truncf %174 : vector<8x128xf32> to vector<8x128xbf16>
    %cst_31 = arith.constant dense<0.000000e+00> : vector<8x512xf32>
    %177 = tpu.matmul %176, %11, %cst_31 {dimension_numbers = #tpu.dot_dimension_numbers<[1], [0], [0], [1], [0, 0, 1, 1], [], []>} : vector<8x128xbf16>, vector<128x512xbf16>, vector<8x512xf32> -> vector<8x512xf32>
    %178 = arith.addf %175, %177 : vector<8x512xf32>
    %179 = vector.extract_strided_slice %178 {offsets = [0, 0], sizes = [8, 128], strides = [1, 1]} : vector<8x512xf32> to vector<8x128xf32>
    %180 = arith.negf %179 : vector<8x128xf32>
    %181 = math.exp %180 : vector<8x128xf32>
    %cst_32 = arith.constant 1.000000e+00 : f32
    %182 = vector.broadcast %cst_32 : f32 to vector<8x128xf32>
    %183 = arith.addf %182, %181 : vector<8x128xf32>
    %184 = arith.divf %182, %183 : vector<8x128xf32>
    %185 = vector.extract_strided_slice %178 {offsets = [0, 128], sizes = [8, 128], strides = [1, 1]} : vector<8x512xf32> to vector<8x128xf32>
    %186 = arith.negf %185 : vector<8x128xf32>
    %187 = math.exp %186 : vector<8x128xf32>
    %cst_33 = arith.constant 1.000000e+00 : f32
    %188 = vector.broadcast %cst_33 : f32 to vector<8x128xf32>
    %189 = arith.addf %188, %187 : vector<8x128xf32>
    %190 = arith.divf %188, %189 : vector<8x128xf32>
    %191 = vector.extract_strided_slice %178 {offsets = [0, 256], sizes = [8, 128], strides = [1, 1]} : vector<8x512xf32> to vector<8x128xf32>
    %192 = math.tanh %191 : vector<8x128xf32>
    %193 = vector.extract_strided_slice %178 {offsets = [0, 384], sizes = [8, 128], strides = [1, 1]} : vector<8x512xf32> to vector<8x128xf32>
    %194 = arith.negf %193 : vector<8x128xf32>
    %195 = math.exp %194 : vector<8x128xf32>
    %cst_34 = arith.constant 1.000000e+00 : f32
    %196 = vector.broadcast %cst_34 : f32 to vector<8x128xf32>
    %197 = arith.addf %196, %195 : vector<8x128xf32>
    %198 = arith.divf %196, %197 : vector<8x128xf32>
    %199 = arith.mulf %190, %172 : vector<8x128xf32>
    %200 = arith.mulf %184, %192 : vector<8x128xf32>
    %201 = arith.addf %199, %200 : vector<8x128xf32>
    %202 = math.tanh %201 : vector<8x128xf32>
    %203 = arith.mulf %198, %202 : vector<8x128xf32>
    %204 = vector.extract_strided_slice %6 {offsets = [56, 0], sizes = [8, 512], strides = [1, 1]} : vector<64x512xf32> to vector<8x512xf32>
    %205 = arith.truncf %203 : vector<8x128xf32> to vector<8x128xbf16>
    %cst_35 = arith.constant dense<0.000000e+00> : vector<8x512xf32>
    %206 = tpu.matmul %205, %11, %cst_35 {dimension_numbers = #tpu.dot_dimension_numbers<[1], [0], [0], [1], [0, 0, 1, 1], [], []>} : vector<8x128xbf16>, vector<128x512xbf16>, vector<8x512xf32> -> vector<8x512xf32>
    %207 = arith.addf %204, %206 : vector<8x512xf32>
    %208 = vector.extract_strided_slice %207 {offsets = [0, 0], sizes = [8, 128], strides = [1, 1]} : vector<8x512xf32> to vector<8x128xf32>
    %209 = arith.negf %208 : vector<8x128xf32>
    %210 = math.exp %209 : vector<8x128xf32>
    %cst_36 = arith.constant 1.000000e+00 : f32
    %211 = vector.broadcast %cst_36 : f32 to vector<8x128xf32>
    %212 = arith.addf %211, %210 : vector<8x128xf32>
    %213 = arith.divf %211, %212 : vector<8x128xf32>
    %214 = vector.extract_strided_slice %207 {offsets = [0, 128], sizes = [8, 128], strides = [1, 1]} : vector<8x512xf32> to vector<8x128xf32>
    %215 = arith.negf %214 : vector<8x128xf32>
    %216 = math.exp %215 : vector<8x128xf32>
    %cst_37 = arith.constant 1.000000e+00 : f32
    %217 = vector.broadcast %cst_37 : f32 to vector<8x128xf32>
    %218 = arith.addf %217, %216 : vector<8x128xf32>
    %219 = arith.divf %217, %218 : vector<8x128xf32>
    %220 = vector.extract_strided_slice %207 {offsets = [0, 256], sizes = [8, 128], strides = [1, 1]} : vector<8x512xf32> to vector<8x128xf32>
    %221 = math.tanh %220 : vector<8x128xf32>
    %222 = vector.extract_strided_slice %207 {offsets = [0, 384], sizes = [8, 128], strides = [1, 1]} : vector<8x512xf32> to vector<8x128xf32>
    %223 = arith.negf %222 : vector<8x128xf32>
    %224 = math.exp %223 : vector<8x128xf32>
    %cst_38 = arith.constant 1.000000e+00 : f32
    %225 = vector.broadcast %cst_38 : f32 to vector<8x128xf32>
    %226 = arith.addf %225, %224 : vector<8x128xf32>
    %227 = arith.divf %225, %226 : vector<8x128xf32>
    %228 = arith.mulf %219, %201 : vector<8x128xf32>
    %229 = arith.mulf %213, %221 : vector<8x128xf32>
    %230 = arith.addf %228, %229 : vector<8x128xf32>
    %231 = math.tanh %230 : vector<8x128xf32>
    %232 = arith.mulf %227, %231 : vector<8x128xf32>
    %233 = vector.extract_strided_slice %10 {offsets = [0, 0], sizes = [8, 128], strides = [1, 1]} : vector<8x512xf32> to vector<8x128xf32>
    %234 = arith.negf %233 : vector<8x128xf32>
    %235 = math.exp %234 : vector<8x128xf32>
    %cst_39 = arith.constant 1.000000e+00 : f32
    %236 = vector.broadcast %cst_39 : f32 to vector<8x128xf32>
    %237 = arith.addf %236, %235 : vector<8x128xf32>
    %238 = arith.divf %236, %237 : vector<8x128xf32>
    %239 = vector.extract_strided_slice %10 {offsets = [0, 256], sizes = [8, 128], strides = [1, 1]} : vector<8x512xf32> to vector<8x128xf32>
    %240 = math.tanh %239 : vector<8x128xf32>
    %241 = vector.extract_strided_slice %10 {offsets = [0, 384], sizes = [8, 128], strides = [1, 1]} : vector<8x512xf32> to vector<8x128xf32>
    %242 = arith.negf %241 : vector<8x128xf32>
    %243 = math.exp %242 : vector<8x128xf32>
    %cst_40 = arith.constant 1.000000e+00 : f32
    %244 = vector.broadcast %cst_40 : f32 to vector<8x128xf32>
    %245 = arith.addf %244, %243 : vector<8x128xf32>
    %246 = arith.divf %244, %245 : vector<8x128xf32>
    %247 = arith.mulf %238, %240 : vector<8x128xf32>
    %248 = math.tanh %247 : vector<8x128xf32>
    %249 = arith.mulf %246, %248 : vector<8x128xf32>
    %250 = vector.extract_strided_slice %232 {offsets = [0, 0], sizes = [8, 64], strides = [1, 1]} : vector<8x128xf32> to vector<8x64xf32>
    %c0_41 = arith.constant 0 : index
    %c0_42 = arith.constant 0 : index
    %251 = vector.load %arg6[%c0_41, %c0_42] : memref<8x128xf32, #tpu.memory_space<vmem>>, vector<8x64xf32>
    tpu.vector_store %arg6[%c0_41, %c0_42], %250 {strides = array<i32>} : memref<8x128xf32, #tpu.memory_space<vmem>>, vector<8x64xf32>,
    %252 = vector.extract_strided_slice %249 {offsets = [0, 0], sizes = [8, 64], strides = [1, 1]} : vector<8x128xf32> to vector<8x64xf32>
    %c0_43 = arith.constant 0 : index
    %c64 = arith.constant 64 : index
    %253 = vector.load %arg6[%c0_43, %c64] : memref<8x128xf32, #tpu.memory_space<vmem>>, vector<8x64xf32>
    tpu.vector_store %arg6[%c0_43, %c64], %252 {strides = array<i32>} : memref<8x128xf32, #tpu.memory_space<vmem>>, vector<8x64xf32>,
    return
  }
  func.func @transform_0(%arg0: i32) -> (i32, i32) {
    %c0_i32 = arith.constant 0 : i32
    %c0_i32_0 = arith.constant 0 : i32
    %c0_i32_1 = arith.constant 0 : i32
    return %c0_i32, %c0_i32_0 : i32, i32
  }
  func.func @transform_1(%arg0: i32) -> (i32, i32) {
    %c0_i32 = arith.constant 0 : i32
    %c0_i32_0 = arith.constant 0 : i32
    %c0_i32_1 = arith.constant 0 : i32
    return %c0_i32, %c0_i32_0 : i32, i32
  }
  func.func @transform_2(%arg0: i32) -> (i32, i32) {
    %c0_i32 = arith.constant 0 : i32
    %c0_i32_0 = arith.constant 0 : i32
    %c0_i32_1 = arith.constant 0 : i32
    return %c0_i32, %c0_i32_0 : i32, i32
  }
  func.func @transform_3(%arg0: i32) -> (i32, i32) {
    %c0_i32 = arith.constant 0 : i32
    %c0_i32_0 = arith.constant 0 : i32
    %c0_i32_1 = arith.constant 0 : i32
    return %c0_i32, %c0_i32_0 : i32, i32
  }
  func.func @transform_4(%arg0: i32) -> (i32, i32) {
    %c0_i32 = arith.constant 0 : i32
    %c0_i32_0 = arith.constant 0 : i32
    %c0_i32_1 = arith.constant 0 : i32
    return %c0_i32, %c0_i32_0 : i32, i32
  }
  func.func @transform_5(%arg0: i32) -> (i32, i32) {
    %c0_i32 = arith.constant 0 : i32
    %c0_i32_0 = arith.constant 0 : i32
    %c0_i32_1 = arith.constant 0 : i32
    return %c0_i32, %c0_i32_0 : i32, i32
  }
}

</mosaic_0001>

<bundles_post_ra>
// kernel: tpu_custom_call.1
= control target key start
LH: loop header
LB: loop body
LE: loop exit
PB: predicated region body
PF: predicated region fallthrough
CT: control target
= control target key end

     0   :  { %10 = vsyncpa [#allocation3], 0  ;;  %s2525_s0 = inlined_call_operand.vmem [shape: bf16[64,32], index: 0, kind: input, shape index: {}]   ;;  %s2526_s1 = inlined_call_operand.hbm [shape: bf16[32,1024], index: 1, kind: input, shape index: {}]   ;;  %s2527_s2 = inlined_call_operand.hbm [shape: bf16[128,512], index: 2, kind: input, shape index: {}]   ;;  %s2528_s3 = inlined_call_operand.vmem [shape: f32[1,512], index: 3, kind: input, shape index: {}]   ;;  %s2529_s4 = inlined_call_operand.vmem [shape: f32[1,512], index: 4, kind: input, shape index: {}]   ;;  %s2530_s5 = inlined_call_operand.hbm [shape: f32[8,128], index: 5, kind: output, shape index: {}]  }
   0x1   :  { %11 = vsyncpa [#allocation6], 0 }
   0x2   :  { %12 = vsyncpa [#allocation4], 0  ;;  %s1941_s18 = smov [#allocation2]   ;;  %s1869_s22 = scalar_lea.hbm %s2526_s1, 2048 }
   0x3   :  { %s20_s19 = sshll.u32 %s1941_s18, 4  ;;  %p1870_p0 = scmp.ne.s32.totalorder %s2526_s1, %s1869_s22  ;;  %s21_s19 = int_to_ptr.vmem [resolvable:$true] %s20_s19 }
   0x4   :  { %p1873_p1 = scmp.lt.u32.totalorder %s1869_s22, %s2526_s1 }
   0x6   :  { %p1875_p2 = pnand %p1873_p1, %p1870_p0 }
   0x8   :  { %1878 = shalt.err (!%p1875_p2)
}
   0x9   :  { %s1879_s27 = scalar_lea.vmem %s21_s19, 2048  ;;  %p1884_p4 = scmp.lt.s32.totalorder %s21_s19, %s21_s19 }
   0xa   :  { %p1880_p3 = scmp.ne.s32.totalorder %s21_s19, %s1879_s27  ;;  %p1885_p5 = scmp.lt.s32.totalorder %s1879_s27, %s1879_s27 }
   0xc   :  { %p1886_p6 = por %p1885_p5, %p1884_p4 }
   0xe   :  { %p1887_p7 = pnand %p1886_p6, %p1880_p3 }
  0x10   :  { %1890 = shalt.err (!%p1887_p7)
}
  0x11   :  { %s1942_s28 = smov 512   ;;  %s1943_s29 = smov 32  }
  0x12   :  { %26 = dma.hbm_to_vmem [thread:$0]  %s2526_s1, 2048, %s21_s19, [#allocation3], %s1942_s28, %s1942_s28, %s1943_s29  }
  0x13   :  { %s1944_s7 = smov [#allocation5]   ;;  %s1891_s11 = scalar_lea.hbm %s2527_s2, 4096 }
  0x14   :  { %s32_s8 = sshll.u32 %s1944_s7, 4  ;;  %p1892_p8 = scmp.ne.s32.totalorder %s2527_s2, %s1891_s11  ;;  %s33_s8 = int_to_ptr.vmem [resolvable:$true] %s32_s8 }
  0x15   :  { %p1895_p9 = scmp.lt.u32.totalorder %s1891_s11, %s2527_s2 }
  0x17   :  { %p1897_p10 = pnand %p1895_p9, %p1892_p8 }
  0x19   :  { %1900 = shalt.err (!%p1897_p10)
}
  0x1a   :  { %s1901_s16 = scalar_lea.vmem %s33_s8, 4096  ;;  %p1906_p12 = scmp.lt.s32.totalorder %s33_s8, %s33_s8 }
  0x1b   :  { %p1902_p11 = scmp.ne.s32.totalorder %s33_s8, %s1901_s16  ;;  %p1907_p13 = scmp.lt.s32.totalorder %s1901_s16, %s1901_s16 }
  0x1d   :  { %p1908_p0 = por %p1907_p13, %p1906_p12 }
  0x1f   :  { %p1909_p1 = pnand %p1908_p0, %p1902_p11 }
  0x21   :  { %1912 = shalt.err (!%p1909_p1)
}
  0x22   :  { %s1945_s1 = smov 256   ;;  %s1946_s17 = smov 16  }
  0x23   :  { %38 = dma.hbm_to_vmem [thread:$0]  %s2527_s2, 4096, %s33_s8, [#allocation6], %s1945_s1, %s1945_s1, %s1946_s17  }
  0x24   :  { %1935 = dma.done.wait [#allocation3], 2048  }
  0x25   :  { %1936 = vsyncadd [#allocation3], 4294965248 }
  0x26   :  { %1937 = dma.done.wait [#allocation6], 4096  }
  0x27   :  { %1938 = vsyncadd [#allocation6], 4294963200  ;;  %v2534_v0 = vmov 0   ;;  %v58_v1 = vld [vmem:[#allocation2] sm:$0xff]  ;;  %v59_v8 = vld [vmem:[#allocation2 + $0x8] sm:$0xff]  ;;  %vm174_vm0 = vcmask 261120   ;;  %v451_v32 = vlaneseq }
  0x28   :  { %219 = vmatprep.mubr.bf16.mxu0 %v2534_v0  ;;  %291 = vmatprep.mubr.bf16.mxu1 %v2534_v0  ;;  %v62_v2 = vld [vmem:[#allocation2 + $0x20] sm:$0xff]  ;;  %v63_v9 = vld [vmem:[#allocation2 + $0x28] sm:$0xff]  ;;  %v60_v14 = vld [vmem:[#allocation2 + $0x10] sm:$0xff]  ;;  %s1949_s29 = smov [#allocation7]   ;;  %vm1523_vm1 = vcmask 523264   ;;  %vm1529_vm2 = vcmask 1048064  }
  0x29   :  { %v66_v3 = vld [vmem:[#allocation2 + $0x40] sm:$0xff]  ;;  %v1552_v4 = vcombine.high %v58_v1, %v62_v2  ;;  %v1551_v5 = vcombine.low %v58_v1, %v62_v2  ;;  %v1554_v10 = vcombine.high %v59_v8, %v63_v9  ;;  %v1553_v11 = vcombine.low %v59_v8, %v63_v9  ;;  %v67_v12 = vld [vmem:[#allocation2 + $0x48] sm:$0xff]  ;;  %v64_v17 = vld [vmem:[#allocation2 + $0x30] sm:$0xff]  ;;  %s1537_s30 = sshll.u32 %s1949_s29, 4  ;;  %s1538_s30 = int_to_ptr.vmem [resolvable:$true] %s1537_s30 }
  0x2a   :  { %v70_v6 = vld [vmem:[#allocation2 + $0x60] sm:$0xff]  ;;  %v71_v13 = vld [vmem:[#allocation2 + $0x68] sm:$0xff]  ;;  %v1556_v18 = vcombine.high %v60_v14, %v64_v17  ;;  %v61_v21 = vld [vmem:[#allocation2 + $0x18] sm:$0xff]  ;;  %v1555_v26 = vcombine.low %v60_v14, %v64_v17  ;;  %v2031_v33 = vshrl.u32 %v451_v32, 7  ;;  %s1913_s6 = scalar_lea.vmem %s1538_s30, 128  ;;  %p1918_p3 = scmp.lt.s32.totalorder %s1538_s30, %s1538_s30 }
  0x2b   :  { %v1560_v7 = vcombine.high %v66_v3, %v70_v6  ;;  %187 = vmatprep.subr.bf16.mxu0 %v1552_v4  ;;  %v1559_v15 = vcombine.low %v66_v3, %v70_v6  ;;  %v1562_v16 = vcombine.high %v67_v12, %v71_v13  ;;  %259 = vmatprep.subr.bf16.mxu1 %v1554_v10  ;;  %v1649_v19 = vld [vmem:[%s2525_s0] sm:$0xff]   ;;  %v65_v22 = vld [vmem:[#allocation2 + $0x38] sm:$0xff]  ;;  %v68_v24 = vld [vmem:[#allocation2 + $0x50] sm:$0xff]  ;;  %p1914_p2 = scmp.ne.s32.totalorder %s1538_s30, %s1913_s6  ;;  %p1919_p4 = scmp.lt.s32.totalorder %s1913_s6, %s1913_s6 }
  0x2c   :  { %188 = vmatpush1.bf16.msra.mxu0 %v1551_v5  ;;  %260 = vmatpush1.bf16.msra.mxu1 %v1553_v11  ;;  %v1561_v20 = vcombine.low %v67_v12, %v71_v13  ;;  %v1558_v23 = vcombine.high %v61_v21, %v65_v22  ;;  %v72_v25 = vld [vmem:[#allocation2 + $0x70] sm:$0xff]  ;;  %v1557_v28 = vcombine.low %v61_v21, %v65_v22  ;;  %v1650_v30 = vld [vmem:[%s2525_s0 + $0x8] sm:$0xff]   ;;  %v457_v34 = vsub.s32 1, %v2031_v33  ;;  %v2037_v35 = vld [vmem:[%s2528_s3] sm:$0xf] }
  0x2d   :  { %189 = vmatprep.subr.bf16.mxu0 %v1560_v7  ;;  %261 = vmatprep.subr.bf16.mxu1 %v1562_v16  ;;  %v1564_v27 = vcombine.high %v68_v24, %v72_v25  ;;  %v1563_v29 = vcombine.low %v68_v24, %v72_v25  ;;  %v2023_v31 = vld [vmem:[%s2525_s0 + $0x10] sm:$0xff]   ;;  %v2042_v36 = vld [vmem:[%s2525_s0 + $0x18] sm:$0xff]   ;;  %v2533_v11 = vsub.s32 0, %v2031_v33  ;;  %v2532_v12 = vsub.s32 3, %v2031_v33  ;;  %p1920_p5 = por %p1919_p4, %p1918_p3 }
  0x2e   :  { %v2045_v37 = vrot.slane %v2037_v35, %v457_v34  ;;  %v69_v38 = vld [vmem:[#allocation2 + $0x58] sm:$0xff]  ;;  %v2054_v42 = vld [vmem:[#allocation5 + $0x4] ss:$16 sps:$4 sm:$0xff]   ;;  %v2059_v44 = vld [vmem:[#allocation5] ss:$16 sps:$4 sm:$0xff]   ;;  %v2531_v25 = vsub.s32 2, %v2031_v33 }
  0x2f   :  { %v73_v39 = vld [vmem:[#allocation2 + $0x78] sm:$0xff]  ;;  %v2068_v46 = vld [vmem:[#allocation5 + $0x24] ss:$16 sps:$4 sm:$0xff]   ;;  %v2073_v48 = vld [vmem:[#allocation5 + $0x20] ss:$16 sps:$4 sm:$0xff]   ;;  %v2176_v13 = vrot.slane %v2037_v35, %v2533_v11  ;;  %p1921_p6 = pnand %p1920_p5, %p1914_p2 }
  0x30   :  { %190 = vmatpush1.bf16.msra.mxu0 %v1559_v15  ;;  %262 = vmatpush1.bf16.msra.mxu1 %v1561_v20  ;;  %v1566_v40 = vcombine.high %v69_v38, %v73_v39  ;;  %v1565_v41 = vcombine.low %v69_v38, %v73_v39  ;;  %v2056_v43 = vld [vmem:[#allocation5 + $0xc] ss:$16 sps:$4 sm:$0xff]   ;;  %v2061_v45 = vld [vmem:[#allocation5 + $0x8] ss:$16 sps:$4 sm:$0xff]   ;;  %v2082_v50 = vld [vmem:[#allocation5 + $0x44] ss:$16 sps:$4 sm:$0xff]   ;;  %v2181_v15 = vrot.slane %v2037_v35, %v2532_v12 }
  0x31   :  { %332 = vmatprep.subr.bf16.mxu0 %v1556_v18  ;;  %390 = vmatprep.subr.bf16.mxu1 %v1558_v23  ;;  %v2070_v47 = vld [vmem:[#allocation5 + $0x2c] ss:$16 sps:$4 sm:$0xff]   ;;  %v2075_v49 = vld [vmem:[#allocation5 + $0x28] ss:$16 sps:$4 sm:$0xff]   ;;  %v2086_v52 = vld [vmem:[#allocation5 + $0x40] ss:$16 sps:$4 sm:$0xff]  }
  0x32   :  { %v2084_v51 = vld [vmem:[#allocation5 + $0x4c] ss:$16 sps:$4 sm:$0xff]   ;;  %v2088_v53 = vld [vmem:[#allocation5 + $0x48] ss:$16 sps:$4 sm:$0xff]   ;;  %v2096_v54 = vld [vmem:[#allocation5 + $0x64] ss:$16 sps:$4 sm:$0xff]  }
  0x33   :  { %1567 = vmatmul.mubr.msk.bf16.vlgmr.msra.gmra.mrb[0].mxu0 %vm174_vm0, %v1649_v19  ;;  %1571 = vmatmul.mubr.msk.bf16.vlgmr.msra.gmra.mrb[0].mxu1 %vm174_vm0, %v1649_v19  ;;  %v2098_v55 = vld [vmem:[#allocation5 + $0x6c] ss:$16 sps:$4 sm:$0xff]   ;;  %v2101_v56 = vld [vmem:[#allocation5 + $0x60] ss:$16 sps:$4 sm:$0xff]   ;;  %v2103_v57 = vld [vmem:[#allocation5 + $0x68] ss:$16 sps:$4 sm:$0xff]  }
  0x34   :  { %333 = vmatpush1.bf16.msra.mxu0 %v1555_v26  ;;  %228 = vmatprep.mubr.bf16.mxu0 %v2534_v0  ;;  %v2111_v58 = vld [vmem:[#allocation5 + $0x84] ss:$16 sps:$4 sm:$0xff]   ;;  %v2113_v59 = vld [vmem:[#allocation5 + $0x8c] ss:$16 sps:$4 sm:$0xff]   ;;  %v2115_v60 = vld [vmem:[#allocation5 + $0x80] ss:$16 sps:$4 sm:$0xff]  }
  0x35   :  { %334 = vmatprep.subr.bf16.mxu0 %v1564_v27  ;;  %301 = vmatprep.mubr.bf16.mxu1 %v2534_v0  ;;  %v2117_v61 = vld [vmem:[#allocation5 + $0x88] ss:$16 sps:$4 sm:$0xff]   ;;  %v2125_v62 = vld [vmem:[#allocation5 + $0xa4] ss:$16 sps:$4 sm:$0xff]   ;;  %v2127_v63 = vld [vmem:[#allocation5 + $0xa0] ss:$16 sps:$4 sm:$0xff]  }
  0x36   :  { %391 = vmatpush1.bf16.msra.mxu1 %v1557_v28  ;;  %v2129_v1 = vld [vmem:[#allocation5 + $0xac] ss:$16 sps:$4 sm:$0xff]   ;;  %v2132_v2 = vld [vmem:[#allocation5 + $0xa8] ss:$16 sps:$4 sm:$0xff]   ;;  %v2137_v3 = vld [vmem:[#allocation5 + $0xc4] ss:$16 sps:$4 sm:$0xff]  }
  0x37   :  { %392 = vmatprep.subr.bf16.mxu1 %v1566_v40  ;;  %v2139_v4 = vld [vmem:[#allocation5 + $0xcc] ss:$16 sps:$4 sm:$0xff]   ;;  %v2142_v5 = vld [vmem:[#allocation5 + $0xc0] ss:$16 sps:$4 sm:$0xff]   ;;  %v2147_v6 = vld [vmem:[#allocation5 + $0xc8] ss:$16 sps:$4 sm:$0xff]  }
  0x38   :  { %335 = vmatpush1.bf16.msra.mxu0 %v1563_v29  ;;  %v2149_v7 = vld [vmem:[#allocation5 + $0xe4] ss:$16 sps:$4 sm:$0xff]   ;;  %v2153_v8 = vld [vmem:[#allocation5 + $0xec] ss:$16 sps:$4 sm:$0xff]   ;;  %v2159_v9 = vld [vmem:[#allocation5 + $0xe0] ss:$16 sps:$4 sm:$0xff]   ;;  %v2199_v29 = vrot.slane %v2037_v35, %v2531_v25 }
  0x39   :  { %731 = vmatprep.subr.bf16.mxu0 %v2054_v42  ;;  %v2164_v10 = vld [vmem:[#allocation5 + $0xe8] ss:$16 sps:$4 sm:$0xff]  }
  0x3a   :  { %393 = vmatpush1.bf16.msra.mxu1 %v1565_v41 }
  0x3b   :  { %1568 = vmatmul.mubr.msk.bf16.gmra.mrb[4].mxu0 %vm174_vm0, %v1650_v30  ;;  %1572 = vmatmul.mubr.msk.bf16.gmra.mrb[4].mxu1 %vm174_vm0, %v1650_v30 }
  0x3c   :  { %238 = vmatprep.mubr.bf16.mxu0 %v2534_v0  ;;  %311 = vmatprep.mubr.bf16.mxu1 %v2534_v0 }
  0x3d   :  { %772 = vmatprep.subr.bf16.mxu1 %v2056_v43 }
  0x43   :  { %1569 = vmatmul.mubr.msk.bf16.gmra.mrb[8].mxu0 %vm174_vm0, %v2023_v31  ;;  %1573 = vmatmul.mubr.msk.bf16.gmra.mrb[8].mxu1 %vm174_vm0, %v2023_v31 }
  0x44   :  { %248 = vmatprep.mubr.bf16.mxu0 %v2534_v0  ;;  %321 = vmatprep.mubr.bf16.mxu1 %v2534_v0 }
  0x4b   :  { %1570 = vmatmul.mubr.msk.bf16.gmra.mrb[12].mxu0 %vm174_vm0, %v2042_v36  ;;  %1574 = vmatmul.mubr.msk.bf16.gmra.mrb[12].mxu1 %vm174_vm0, %v2042_v36 }
  0x4c   :  { %364 = vmatprep.mubr.bf16.mxu0 %v2534_v0  ;;  %422 = vmatprep.mubr.bf16.mxu1 %v2534_v0 }
  0x53   :  { %1575 = vmatmul.mubr.msk.bf16.vlgmr.msra.gmra.mrb[16].mxu0 %vm174_vm0, %v1649_v19  ;;  %1579 = vmatmul.mubr.msk.bf16.vlgmr.msra.gmra.mrb[16].mxu1 %vm174_vm0, %v1649_v19 }
  0x54   :  { %370 = vmatprep.mubr.bf16.mxu0 %v2534_v0  ;;  %732 = vmatpush1.bf16.msra.mxu0 %v2059_v44 }
  0x55   :  { %773 = vmatpush1.bf16.msra.mxu1 %v2061_v45  ;;  %428 = vmatprep.mubr.bf16.mxu1 %v2534_v0 }
  0x56   :  { %733 = vmatprep.subr.bf16.mxu0 %v2068_v46  ;;  %774 = vmatprep.subr.bf16.mxu1 %v2070_v47 }
  0x58   :  { %734 = vmatpush1.bf16.msra.mxu0 %v2073_v48 }
  0x59   :  { %775 = vmatpush1.bf16.msra.mxu1 %v2075_v49  ;;  %735 = vmatprep.subr.bf16.mxu0 %v2082_v50 }
  0x5a   :  { %776 = vmatprep.subr.bf16.mxu1 %v2084_v51 }
  0x5b   :  { %1576 = vmatmul.mubr.msk.bf16.gmra.mrb[20].mxu0 %vm174_vm0, %v1650_v30  ;;  %1580 = vmatmul.mubr.msk.bf16.gmra.mrb[20].mxu1 %vm174_vm0, %v1650_v30 }
  0x5c   :  { %376 = vmatprep.mubr.bf16.mxu0 %v2534_v0  ;;  %736 = vmatpush1.bf16.msra.mxu0 %v2086_v52 }
  0x5d   :  { %777 = vmatpush1.bf16.msra.mxu1 %v2088_v53  ;;  %434 = vmatprep.mubr.bf16.mxu1 %v2534_v0 }
  0x5e   :  { %737 = vmatprep.subr.bf16.mxu0 %v2096_v54  ;;  %778 = vmatprep.subr.bf16.mxu1 %v2098_v55 }
  0x60   :  { %738 = vmatpush1.bf16.msra.mxu0 %v2101_v56 }
  0x61   :  { %779 = vmatpush1.bf16.msra.mxu1 %v2103_v57  ;;  %739 = vmatprep.subr.bf16.mxu0 %v2111_v58 }
  0x62   :  { %780 = vmatprep.subr.bf16.mxu1 %v2113_v59 }
  0x63   :  { %1577 = vmatmul.mubr.msk.bf16.gmra.mrb[24].mxu0 %vm174_vm0, %v2023_v31  ;;  %1581 = vmatmul.mubr.msk.bf16.gmra.mrb[24].mxu1 %vm174_vm0, %v2023_v31 }
  0x64   :  { %382 = vmatprep.mubr.bf16.mxu0 %v2534_v0  ;;  %740 = vmatpush1.bf16.msra.mxu0 %v2115_v60 }
  0x65   :  { %781 = vmatpush1.bf16.msra.mxu1 %v2117_v61  ;;  %440 = vmatprep.mubr.bf16.mxu1 %v2534_v0 }
  0x66   :  { %741 = vmatprep.subr.bf16.mxu0 %v2125_v62  ;;  %782 = vmatprep.subr.bf16.mxu1 %v2129_v1 }
  0x68   :  { %742 = vmatpush1.bf16.msra.mxu0 %v2127_v63 }
  0x69   :  { %783 = vmatpush1.bf16.msra.mxu1 %v2132_v2  ;;  %743 = vmatprep.subr.bf16.mxu0 %v2137_v3 }
  0x6a   :  { %784 = vmatprep.subr.bf16.mxu1 %v2139_v4 }
  0x6b   :  { %1578 = vmatmul.mubr.msk.bf16.gmra.mrb[28].mxu0 %vm174_vm0, %v2042_v36  ;;  %1582 = vmatmul.mubr.msk.bf16.gmra.mrb[28].mxu1 %vm174_vm0, %v2042_v36 }
  0x6c   :  { %763 = vmatprep.mubr.bf16.mxu0 %v2534_v0  ;;  %744 = vmatpush1.bf16.msra.mxu0 %v2142_v5 }
  0x6d   :  { %804 = vmatprep.mubr.bf16.mxu1 %v2534_v0  ;;  %785 = vmatpush1.bf16.msra.mxu1 %v2147_v6 }
  0x6e   :  { %745 = vmatprep.subr.bf16.mxu0 %v2149_v7  ;;  %786 = vmatprep.subr.bf16.mxu1 %v2153_v8 }
  0x70   :  { %746 = vmatpush1.bf16.msra.mxu0 %v2159_v9 }
  0x71   :  { %787 = vmatpush1.bf16.msra.mxu1 %v2164_v10  ;;  %842 = vmatprep.subr.bf16.mxu0 %v2054_v42 }
  0x72   :  { %883 = vmatprep.subr.bf16.mxu1 %v2056_v43 }
 0x106   :  { %v221_v14 = vpop.f32.mrb[0].mxu0  ;;  %v293_v19 = vpop.f32.mrb[0].mxu1 }
 0x107   :  { %v471_v16 = vadd.f32 %v2176_v13, %v221_v14  ;;  %v223_v17 = vpop.f32.mrb[1].mxu0  ;;  %v295_v22 = vpop.f32.mrb[1].mxu1  ;;  %v472_v39 = vadd.f32 %v2199_v29, %v293_v19 }
 0x108   :  { %v2184_v18 = vpop.f32.mrb[2].mxu0  ;;  %v473_v23 = vadd.f32 %v2181_v15, %v295_v22  ;;  %v2189_v24 = vpop.f32.mrb[2].mxu1 }
 0x109   :  { %v1583_v20 = vmul.f32 -1.442695, %v471_v16  ;;  %v2186_v21 = vpop.f32.mrb[3].mxu0  ;;  %v2192_v26 = vpop.f32.mrb[3].mxu1 }
 0x10a   :  { %v1584_v27 = vmul.f32 -1.442695, %v473_v23 }
 0x10b   :  { %1701 = vpow2.f32 %v1583_v20 }
 0x10c   :  { %1703 = vpow2.f32 %v1584_v27 }
 0x10d   :  { %1705 = vtanh.f32 %v472_v39 }
 0x10e   :  { %v2194_v28 = vpop.f32.mrb[4].mxu0  ;;  %v2205_v32 = vpop.f32.mrb[4].mxu1 }
 0x10f   :  { %v2201_v30 = vpop.f32.mrb[5].mxu0  ;;  %2538 = vst [vmem:[#allocation13_spill] sm:$0xff] %v2205_v32  ;;  %v2209_v36 = vpop.f32.mrb[5].mxu1 }
 0x110   :  { %2536 = vst [vmem:[#allocation11_spill] sm:$0xff] %v2201_v30  ;;  %v2203_v31 = vpop.f32.mrb[6].mxu0  ;;  %2540 = vst [vmem:[#allocation15_spill] sm:$0xff] %v2209_v36  ;;  %v2211_v38 = vpop.f32.mrb[6].mxu1 }
 0x111   :  { %2537 = vst [vmem:[#allocation12_spill] sm:$0xff] %v2203_v31  ;;  %v2207_v34 = vpop.f32.mrb[7].mxu0  ;;  %2541 = vst [vmem:[#allocation16_spill] sm:$0xff] %v2211_v38  ;;  %v2214_v40 = vpop.f32.mrb[7].mxu1 }
 0x112   :  { %2539 = vst [vmem:[#allocation14_spill] sm:$0xff] %v2207_v34  ;;  %2542 = vst [vmem:[#allocation17_spill] sm:$0xff] %v2214_v40 }
 0x115   :  { %v1702_v41 = vpop.eup %1701 }
 0x116   :  { %v557_v35 = vadd.f32 1.0, %v1702_v41  ;;  %v2216_v14 = vpop.f32.mrb[8].mxu0  ;;  %v2222_v20 = vpop.f32.mrb[8].mxu1 }
 0x117   :  { %2543 = vst [vmem:[#allocation18_spill] sm:$0xff] %v2216_v14  ;;  %v2218_v16 = vpop.f32.mrb[9].mxu0  ;;  %2546 = vst [vmem:[#allocation21_spill] sm:$0xff] %v2222_v20  ;;  %v2226_v23 = vpop.f32.mrb[9].mxu1 }
 0x118   :  { %2544 = vst [vmem:[#allocation19_spill] sm:$0xff] %v2218_v16  ;;  %1707 = vrcp.f32 %v557_v35  ;;  %v2220_v17 = vpop.f32.mrb[10].mxu0  ;;  %2548 = vst [vmem:[#allocation23_spill] sm:$0xff] %v2226_v23  ;;  %v2228_v27 = vpop.f32.mrb[10].mxu1 }
 0x119   :  { %2545 = vst [vmem:[#allocation20_spill] sm:$0xff] %v2220_v17  ;;  %v2224_v22 = vpop.f32.mrb[11].mxu0  ;;  %2549 = vst [vmem:[#allocation24_spill] sm:$0xff] %v2228_v27  ;;  %v2230_v19 = vpop.f32.mrb[11].mxu1 }
 0x11a   :  { %2547 = vst [vmem:[#allocation22_spill] sm:$0xff] %v2224_v22  ;;  %2550 = vst [vmem:[#allocation25_spill] sm:$0xff] %v2230_v19  ;;  %v1704_v25 = vpop.eup %1703 }
 0x11b   :  { %v564_v41 = vadd.f32 1.0, %v1704_v25  ;;  %v1706_v12 = vpop.eup %1705  ;;  %v2551_v25 = vmov 0  }
 0x11d   :  { %1709 = vrcp.f32 %v564_v41 }
 0x122   :  { %v1708_v11 = vpop.eup %1707 }
 0x123   :  { %v2232_v39 = vmul.f32 %v1708_v11, %v1706_v12  ;;  %v2271_v11 = vpop.f32.mrb[12].mxu1 }
 0x124   :  { %2553 = vst [vmem:[#allocation27_spill] sm:$0xff] %v2271_v11 }
 0x125   :  { %1711 = vtanh.f32 %v2232_v39 }
 0x127   :  { %v1710_v35 = vpop.eup %1709 }
 0x12f   :  { %v1712_v0 = vpop.eup %1711 }
 0x130   :  { %v569_v17 = vmul.f32 %v1712_v0, %v1710_v35  ;;  %v2269_v0 = vpop.f32.mrb[12].mxu0 }
 0x131   :  { %2552 = vst [vmem:[#allocation26_spill] sm:$0xff] %v2269_v0  ;;  %v2273_v12 = vpop.f32.mrb[13].mxu0 }
 0x132   :  { %v570_v16 = vpack.c.bf16 %v569_v17, %v569_v17  ;;  %2554 = vst [vmem:[#allocation28_spill] sm:$0xff] %v2273_v12  ;;  %v2277_v17 = vpop.f32.mrb[14].mxu0 }
 0x133   :  { %2556 = vst [vmem:[#allocation30_spill] sm:$0xff] %v2277_v17  ;;  %v2281_v35 = vpop.f32.mrb[15].mxu0 }
 0x134   :  { %764 = vmatmul.mubr.bf16.vlgmr.msra.gmra.mrb[32].mxu0 %v570_v16  ;;  %805 = vmatmul.mubr.bf16.vlgmr.msra.gmra.mrb[32].mxu1 %v570_v16  ;;  %v2275_v16 = vpop.f32.mrb[13].mxu1  ;;  %2558 = vst [vmem:[#allocation32_spill] sm:$0xff] %v2281_v35  ;;  %v366_v22 = vpop.f32.mrb[16].mxu0 }
 0x135   :  { %843 = vmatpush1.bf16.msra.mxu0 %v2059_v44  ;;  %884 = vmatpush1.bf16.msra.mxu1 %v2061_v45  ;;  %2555 = vst [vmem:[#allocation29_spill] sm:$0xff] %v2275_v16  ;;  %v2279_v41 = vpop.f32.mrb[14].mxu1  ;;  %v367_v27 = vpop.f32.mrb[17].mxu0 }
 0x136   :  { %844 = vmatprep.subr.bf16.mxu0 %v2068_v46  ;;  %885 = vmatprep.subr.bf16.mxu1 %v2070_v47  ;;  %2557 = vst [vmem:[#allocation31_spill] sm:$0xff] %v2279_v41  ;;  %v2283_v19 = vpop.f32.mrb[15].mxu1  ;;  %v368_v23 = vpop.f32.mrb[18].mxu0 }
 0x137   :  { %874 = vmatprep.mubr.bf16.mxu0 %v2551_v25  ;;  %915 = vmatprep.mubr.bf16.mxu1 %v2551_v25  ;;  %2559 = vst [vmem:[#allocation33_spill] sm:$0xff] %v2283_v19  ;;  %v369_v20 = vpop.f32.mrb[19].mxu0  ;;  %v424_v14 = vpop.f32.mrb[16].mxu1 }
 0x138   :  { %v425_v0 = vpop.f32.mrb[17].mxu1  ;;  %v372_v34 = vpop.f32.mrb[20].mxu0  ;;  %v502_v14 = vld [vmem:[%s2529_s4] sm:$0xf]  ;;  %s1948_s4 = smov 64  }
 0x139   :  { %845 = vmatpush1.bf16.msra.mxu0 %v2073_v48  ;;  %886 = vmatpush1.bf16.msra.mxu1 %v2075_v49  ;;  %v426_v40 = vpop.f32.mrb[18].mxu1  ;;  %v373_v12 = vpop.f32.mrb[21].mxu0  ;;  %v2560_v34 = vsub.s32 0, %v2031_v33 }
 0x13a   :  { %846 = vmatprep.subr.bf16.mxu0 %v2082_v50  ;;  %887 = vmatprep.subr.bf16.mxu1 %v2084_v51  ;;  %v427_v11 = vpop.f32.mrb[19].mxu1  ;;  %v374_v38 = vpop.f32.mrb[22].mxu0 }
 0x13b   :  { %v430_v16 = vpop.f32.mrb[20].mxu1  ;;  %v375_v31 = vpop.f32.mrb[23].mxu0  ;;  %v507_v38 = vrot.slane %v502_v14, %v2560_v34 }
 0x13c   :  { %v431_v17 = vpop.f32.mrb[21].mxu1  ;;  %v378_v30 = vpop.f32.mrb[24].mxu0 }
 0x13d   :  { %847 = vmatpush1.bf16.msra.mxu0 %v2086_v52  ;;  %888 = vmatpush1.bf16.msra.mxu1 %v2088_v53  ;;  %v432_v36 = vpop.f32.mrb[22].mxu1  ;;  %v379_v35 = vpop.f32.mrb[25].mxu0 }
 0x13e   :  { %848 = vmatprep.subr.bf16.mxu0 %v2096_v54  ;;  %889 = vmatprep.subr.bf16.mxu1 %v2098_v55  ;;  %v433_v41 = vpop.f32.mrb[23].mxu1  ;;  %v380_v32 = vpop.f32.mrb[26].mxu0 }
 0x13f   :  { %v436_v19 = vpop.f32.mrb[24].mxu1  ;;  %v381_v22 = vpop.f32.mrb[27].mxu0  ;;  %v2561_v32 = vsub.s32 3, %v2031_v33 }
 0x140   :  { %v437_v27 = vpop.f32.mrb[25].mxu1  ;;  %v384_v23 = vpop.f32.mrb[28].mxu0  ;;  %v2562_v22 = vsub.s32 2, %v2031_v33  ;;  %v474_v33 = vadd.f32 %v2176_v13, %v2184_v18 }
 0x141   :  { %849 = vmatpush1.bf16.msra.mxu0 %v2101_v56  ;;  %890 = vmatpush1.bf16.msra.mxu1 %v2103_v57  ;;  %v438_v40 = vpop.f32.mrb[26].mxu1  ;;  %v385_v31 = vpop.f32.mrb[29].mxu0  ;;  %v515_v19 = vrot.slane %v502_v14, %v2561_v32 }
 0x142   :  { %850 = vmatprep.subr.bf16.mxu0 %v2111_v58  ;;  %891 = vmatprep.subr.bf16.mxu1 %v2113_v59  ;;  %v439_v20 = vpop.f32.mrb[27].mxu1  ;;  %v386_v0 = vpop.f32.mrb[30].mxu0  ;;  %v511_v27 = vrot.slane %v502_v14, %v2562_v22  ;;  %v476_v14 = vadd.f32 %v2199_v29, %v2189_v24 }
 0x143   :  { %v442_v36 = vpop.f32.mrb[28].mxu1  ;;  %v519_v11 = vadd.f32 %v507_v38, %v386_v0  ;;  %v388_v30 = vpop.f32.mrb[31].mxu0 }
 0x144   :  { %v443_v12 = vpop.f32.mrb[29].mxu1 }
 0x145   :  { %851 = vmatpush1.bf16.msra.mxu0 %v2115_v60  ;;  %892 = vmatpush1.bf16.msra.mxu1 %v2117_v61  ;;  %v444_v16 = vpop.f32.mrb[30].mxu1  ;;  %v1638_v17 = vmul.f32 -1.442695, %v519_v11 }
 0x146   :  { %852 = vmatprep.subr.bf16.mxu0 %v2125_v62  ;;  %893 = vmatprep.subr.bf16.mxu1 %v2129_v1  ;;  %v446_v41 = vpop.f32.mrb[31].mxu1  ;;  %v520_v20 = vadd.f32 %v511_v27, %v444_v16  ;;  %v477_v16 = vadd.f32 %v2181_v15, %v2192_v26 }
 0x147   :  { %1713 = vpow2.f32 %v1638_v17  ;;  %v521_v35 = vadd.f32 %v515_v19, %v446_v41  ;;  %v475_v19 = vadd.f32 %v2045_v37, %v2186_v21 }
 0x149   :  { %853 = vmatpush1.bf16.msra.mxu0 %v2127_v63  ;;  %894 = vmatpush1.bf16.msra.mxu1 %v2132_v2  ;;  %v1639_v40 = vmul.f32 -1.442695, %v521_v35 }
 0x14a   :  { %854 = vmatprep.subr.bf16.mxu0 %v2137_v3  ;;  %895 = vmatprep.subr.bf16.mxu1 %v2139_v4 }
 0x14b   :  { %1715 = vpow2.f32 %v1639_v40 }
 0x14c   :  { %1717 = vtanh.f32 %v520_v20 }
 0x14d   :  { %855 = vmatpush1.bf16.msra.mxu0 %v2142_v5  ;;  %896 = vmatpush1.bf16.msra.mxu1 %v2147_v6 }
 0x14e   :  { %856 = vmatprep.subr.bf16.mxu0 %v2149_v7  ;;  %897 = vmatprep.subr.bf16.mxu1 %v2153_v8 }
 0x151   :  { %857 = vmatpush1.bf16.msra.mxu0 %v2159_v9  ;;  %898 = vmatpush1.bf16.msra.mxu1 %v2164_v10  ;;  %v1714_v34 = vpop.eup %1713 }
 0x152   :  { %953 = vmatprep.subr.bf16.mxu0 %v2054_v42  ;;  %994 = vmatprep.subr.bf16.mxu1 %v2056_v43  ;;  %v1510_v23 = vadd.f32 1.0, %v1714_v34 }
 0x154   :  { %1719 = vrcp.f32 %v1510_v23 }
 0x155   :  { %v1716_v38 = vpop.eup %1715 }
 0x156   :  { %v1718_v31 = vpop.eup %1717  ;;  %v1517_v0 = vadd.f32 1.0, %v1716_v38 }
 0x158   :  { %1721 = vrcp.f32 %v1517_v0 }
 0x15e   :  { %v1720_v36 = vpop.eup %1719 }
 0x15f   :  { %v1520_v30 = vmul.f32 %v1720_v36, %v1718_v31 }
 0x161   :  { %1723 = vtanh.f32 %v1520_v30 }
 0x162   :  { %v1722_v11 = vpop.eup %1721 }
 0x16b   :  { %v1724_v12 = vpop.eup %1723 }
 0x16c   :  { %v1522_v32 = vmul.f32 %v1724_v12, %v1722_v11 }
 0x16e   :  { %1526 = vrot.lane.b32.xlu0 %v1522_v32, %s1948_s4 }
 0x207   :  { %v765_v17 = vpop.f32.mrb[32].mxu0  ;;  %v806_v41 = vpop.f32.mrb[32].mxu1 }
 0x208   :  { %v813_v35 = vadd.f32 %v765_v17, %v474_v33  ;;  %v815_v22 = vadd.f32 %v806_v41, %v476_v14  ;;  %v767_v27 = vpop.f32.mrb[33].mxu0  ;;  %v808_v40 = vpop.f32.mrb[33].mxu1 }
 0x209   :  { %v814_v20 = vadd.f32 %v767_v27, %v475_v19  ;;  %v816_v34 = vadd.f32 %v808_v40, %v477_v16  ;;  %v769_v23 = vpop.f32.mrb[34].mxu0  ;;  %v810_v38 = vpop.f32.mrb[34].mxu1 }
 0x20a   :  { %v1617_v18 = vmul.f32 -1.442695, %v813_v35  ;;  %v770_v31 = vpop.f32.mrb[35].mxu0  ;;  %v811_v0 = vpop.f32.mrb[35].mxu1  ;;  %v2564_v23 = vld [vmem:[#allocation11_spill] sm:$0xff] }
 0x20b   :  { %v1618_v24 = vmul.f32 -1.442695, %v814_v20  ;;  %v1619_v21 = vmul.f32 -1.442695, %v816_v34  ;;  %v2563_v20 = vld [vmem:[#allocation13_spill] sm:$0xff]  ;;  %v479_v38 = vadd.f32 %v2045_v37, %v2564_v23 }
 0x20c   :  { %1725 = vpow2.f32 %v1617_v18  ;;  %v480_v34 = vadd.f32 %v2199_v29, %v2563_v20  ;;  %v2565_v18 = vld [vmem:[#allocation15_spill] sm:$0xff] }
 0x20d   :  { %1727 = vpow2.f32 %v1618_v24  ;;  %v481_v31 = vadd.f32 %v2181_v15, %v2565_v18 }
 0x20e   :  { %1729 = vpow2.f32 %v1619_v21 }
 0x20f   :  { %1731 = vtanh.f32 %v815_v22 }
 0x216   :  { %v1726_v36 = vpop.eup %1725 }
 0x217   :  { %v1728_v30 = vpop.eup %1727  ;;  %v820_v26 = vadd.f32 1.0, %v1726_v36 }
 0x218   :  { %v826_v11 = vadd.f32 1.0, %v1728_v30  ;;  %v1730_v12 = vpop.eup %1729 }
 0x219   :  { %1733 = vrcp.f32 %v820_v26  ;;  %v1732_v32 = vpop.eup %1731  ;;  %v833_v16 = vadd.f32 1.0, %v1730_v12 }
 0x21a   :  { %1735 = vrcp.f32 %v826_v11 }
 0x21b   :  { %1737 = vrcp.f32 %v833_v16 }
 0x223   :  { %v1734_v33 = vpop.eup %1733 }
 0x224   :  { %v1736_v14 = vpop.eup %1735  ;;  %v837_v19 = vmul.f32 %v1734_v33, %v1732_v32 }
 0x225   :  { %v836_v17 = vmul.f32 %v1736_v14, %v2232_v39  ;;  %v1738_v35 = vpop.eup %1737  ;;  %v478_v39 = vadd.f32 %v2176_v13, %v2194_v28 }
 0x227   :  { %v2303_v41 = vadd.f32 %v837_v19, %v836_v17 }
 0x229   :  { %1739 = vtanh.f32 %v2303_v41 }
 0x233   :  { %v1740_v27 = vpop.eup %1739 }
 0x234   :  { %v840_v40 = vmul.f32 %v1740_v27, %v1738_v35 }
 0x236   :  { %v841_v22 = vpack.c.bf16 %v840_v40, %v840_v40 }
 0x238   :  { %875 = vmatmul.mubr.bf16.vlgmr.msra.gmra.mrb[36].mxu0 %v841_v22  ;;  %916 = vmatmul.mubr.bf16.vlgmr.msra.gmra.mrb[36].mxu1 %v841_v22 }
 0x239   :  { %954 = vmatpush1.bf16.msra.mxu0 %v2059_v44  ;;  %995 = vmatpush1.bf16.msra.mxu1 %v2061_v45 }
 0x23a   :  { %955 = vmatprep.subr.bf16.mxu0 %v2068_v46  ;;  %996 = vmatprep.subr.bf16.mxu1 %v2070_v47 }
 0x23b   :  { %985 = vmatprep.mubr.bf16.mxu0 %v2551_v25  ;;  %1026 = vmatprep.mubr.bf16.mxu1 %v2551_v25 }
 0x23d   :  { %956 = vmatpush1.bf16.msra.mxu0 %v2073_v48  ;;  %997 = vmatpush1.bf16.msra.mxu1 %v2075_v49 }
 0x23e   :  { %957 = vmatprep.subr.bf16.mxu0 %v2082_v50  ;;  %998 = vmatprep.subr.bf16.mxu1 %v2084_v51 }
 0x241   :  { %958 = vmatpush1.bf16.msra.mxu0 %v2086_v52  ;;  %999 = vmatpush1.bf16.msra.mxu1 %v2088_v53 }
 0x242   :  { %959 = vmatprep.subr.bf16.mxu0 %v2096_v54  ;;  %1000 = vmatprep.subr.bf16.mxu1 %v2098_v55 }
 0x245   :  { %960 = vmatpush1.bf16.msra.mxu0 %v2101_v56  ;;  %1001 = vmatpush1.bf16.msra.mxu1 %v2103_v57 }
 0x246   :  { %961 = vmatprep.subr.bf16.mxu0 %v2111_v58  ;;  %1002 = vmatprep.subr.bf16.mxu1 %v2113_v59 }
 0x249   :  { %962 = vmatpush1.bf16.msra.mxu0 %v2115_v60  ;;  %1003 = vmatpush1.bf16.msra.mxu1 %v2117_v61 }
 0x24a   :  { %963 = vmatprep.subr.bf16.mxu0 %v2125_v62  ;;  %1004 = vmatprep.subr.bf16.mxu1 %v2129_v1 }
 0x24d   :  { %964 = vmatpush1.bf16.msra.mxu0 %v2127_v63  ;;  %1005 = vmatpush1.bf16.msra.mxu1 %v2132_v2 }
 0x24e   :  { %965 = vmatprep.subr.bf16.mxu0 %v2137_v3  ;;  %1006 = vmatprep.subr.bf16.mxu1 %v2139_v4 }
 0x251   :  { %966 = vmatpush1.bf16.msra.mxu0 %v2142_v5  ;;  %1007 = vmatpush1.bf16.msra.mxu1 %v2147_v6 }
 0x252   :  { %967 = vmatprep.subr.bf16.mxu0 %v2149_v7  ;;  %1008 = vmatprep.subr.bf16.mxu1 %v2153_v8 }
 0x255   :  { %968 = vmatpush1.bf16.msra.mxu0 %v2159_v9  ;;  %1009 = vmatpush1.bf16.msra.mxu1 %v2164_v10 }
 0x256   :  { %1064 = vmatprep.subr.bf16.mxu0 %v2054_v42  ;;  %1105 = vmatprep.subr.bf16.mxu1 %v2056_v43 }
 0x30b   :  { %v876_v0 = vpop.f32.mrb[36].mxu0  ;;  %v917_v24 = vpop.f32.mrb[36].mxu1 }
 0x30c   :  { %v924_v21 = vadd.f32 %v876_v0, %v478_v39  ;;  %v926_v36 = vadd.f32 %v917_v24, %v480_v34  ;;  %v878_v30 = vpop.f32.mrb[37].mxu0  ;;  %v919_v26 = vpop.f32.mrb[37].mxu1 }
 0x30d   :  { %v925_v11 = vadd.f32 %v878_v30, %v479_v38  ;;  %v927_v12 = vadd.f32 %v919_v26, %v481_v31  ;;  %v880_v32 = vpop.f32.mrb[38].mxu0  ;;  %v921_v33 = vpop.f32.mrb[38].mxu1 }
 0x30e   :  { %v1620_v28 = vmul.f32 -1.442695, %v924_v21  ;;  %v881_v14 = vpop.f32.mrb[39].mxu0  ;;  %v922_v19 = vpop.f32.mrb[39].mxu1  ;;  %v2568_v32 = vld [vmem:[#allocation14_spill] sm:$0xff] }
 0x30f   :  { %v1621_v16 = vmul.f32 -1.442695, %v925_v11  ;;  %v1622_v17 = vmul.f32 -1.442695, %v927_v12  ;;  %v2567_v11 = vld [vmem:[#allocation16_spill] sm:$0xff]  ;;  %v483_v33 = vadd.f32 %v2045_v37, %v2568_v32 }
 0x310   :  { %1741 = vpow2.f32 %v1620_v28  ;;  %v484_v12 = vadd.f32 %v2199_v29, %v2567_v11  ;;  %v2569_v28 = vld [vmem:[#allocation17_spill] sm:$0xff] }
 0x311   :  { %1743 = vpow2.f32 %v1621_v16  ;;  %v485_v14 = vadd.f32 %v2181_v15, %v2569_v28 }
 0x312   :  { %1745 = vpow2.f32 %v1622_v17 }
 0x313   :  { %1747 = vtanh.f32 %v926_v36 }
 0x31a   :  { %v1742_v35 = vpop.eup %1741 }
 0x31b   :  { %v1744_v27 = vpop.eup %1743  ;;  %v931_v40 = vadd.f32 1.0, %v1742_v35 }
 0x31c   :  { %v937_v22 = vadd.f32 1.0, %v1744_v27  ;;  %v1746_v39 = vpop.eup %1745 }
 0x31d   :  { %1749 = vrcp.f32 %v931_v40  ;;  %v1748_v20 = vpop.eup %1747  ;;  %v944_v18 = vadd.f32 1.0, %v1746_v39 }
 0x31e   :  { %1751 = vrcp.f32 %v937_v22 }
 0x31f   :  { %1753 = vrcp.f32 %v944_v18 }
 0x327   :  { %v1750_v34 = vpop.eup %1749 }
 0x328   :  { %v1752_v23 = vpop.eup %1751  ;;  %v948_v38 = vmul.f32 %v1750_v34, %v1748_v20 }
 0x329   :  { %v947_v31 = vmul.f32 %v1752_v23, %v2303_v41  ;;  %v1754_v24 = vpop.eup %1753  ;;  %v2566_v41 = vld [vmem:[#allocation12_spill] sm:$0xff] }
 0x32a   :  { %v482_v26 = vadd.f32 %v2176_v13, %v2566_v41 }
 0x32b   :  { %v2349_v0 = vadd.f32 %v948_v38, %v947_v31 }
 0x32d   :  { %1755 = vtanh.f32 %v2349_v0 }
 0x337   :  { %v1756_v21 = vpop.eup %1755 }
 0x338   :  { %v951_v30 = vmul.f32 %v1756_v21, %v1754_v24 }
 0x33a   :  { %v952_v36 = vpack.c.bf16 %v951_v30, %v951_v30 }
 0x33c   :  { %986 = vmatmul.mubr.bf16.vlgmr.msra.gmra.mrb[40].mxu0 %v952_v36  ;;  %1027 = vmatmul.mubr.bf16.vlgmr.msra.gmra.mrb[40].mxu1 %v952_v36 }
 0x33d   :  { %1065 = vmatpush1.bf16.msra.mxu0 %v2059_v44  ;;  %1106 = vmatpush1.bf16.msra.mxu1 %v2061_v45 }
 0x33e   :  { %1066 = vmatprep.subr.bf16.mxu0 %v2068_v46  ;;  %1107 = vmatprep.subr.bf16.mxu1 %v2070_v47 }
 0x33f   :  { %1096 = vmatprep.mubr.bf16.mxu0 %v2551_v25  ;;  %1137 = vmatprep.mubr.bf16.mxu1 %v2551_v25 }
 0x341   :  { %1067 = vmatpush1.bf16.msra.mxu0 %v2073_v48  ;;  %1108 = vmatpush1.bf16.msra.mxu1 %v2075_v49 }
 0x342   :  { %1068 = vmatprep.subr.bf16.mxu0 %v2082_v50  ;;  %1109 = vmatprep.subr.bf16.mxu1 %v2084_v51 }
 0x345   :  { %1069 = vmatpush1.bf16.msra.mxu0 %v2086_v52  ;;  %1110 = vmatpush1.bf16.msra.mxu1 %v2088_v53 }
 0x346   :  { %1070 = vmatprep.subr.bf16.mxu0 %v2096_v54  ;;  %1111 = vmatprep.subr.bf16.mxu1 %v2098_v55 }
 0x349   :  { %1071 = vmatpush1.bf16.msra.mxu0 %v2101_v56  ;;  %1112 = vmatpush1.bf16.msra.mxu1 %v2103_v57 }
 0x34a   :  { %1072 = vmatprep.subr.bf16.mxu0 %v2111_v58  ;;  %1113 = vmatprep.subr.bf16.mxu1 %v2113_v59 }
 0x34d   :  { %1073 = vmatpush1.bf16.msra.mxu0 %v2115_v60  ;;  %1114 = vmatpush1.bf16.msra.mxu1 %v2117_v61 }
 0x34e   :  { %1074 = vmatprep.subr.bf16.mxu0 %v2125_v62  ;;  %1115 = vmatprep.subr.bf16.mxu1 %v2129_v1 }
 0x351   :  { %1075 = vmatpush1.bf16.msra.mxu0 %v2127_v63  ;;  %1116 = vmatpush1.bf16.msra.mxu1 %v2132_v2 }
 0x352   :  { %1076 = vmatprep.subr.bf16.mxu0 %v2137_v3  ;;  %1117 = vmatprep.subr.bf16.mxu1 %v2139_v4 }
 0x355   :  { %1077 = vmatpush1.bf16.msra.mxu0 %v2142_v5  ;;  %1118 = vmatpush1.bf16.msra.mxu1 %v2147_v6 }
 0x356   :  { %1078 = vmatprep.subr.bf16.mxu0 %v2149_v7  ;;  %1119 = vmatprep.subr.bf16.mxu1 %v2153_v8 }
 0x359   :  { %1079 = vmatpush1.bf16.msra.mxu0 %v2159_v9  ;;  %1120 = vmatpush1.bf16.msra.mxu1 %v2164_v10 }
 0x35a   :  { %1175 = vmatprep.subr.bf16.mxu0 %v2054_v42  ;;  %1216 = vmatprep.subr.bf16.mxu1 %v2056_v43 }
 0x40f   :  { %v987_v19 = vpop.f32.mrb[40].mxu0  ;;  %v1028_v16 = vpop.f32.mrb[40].mxu1 }
 0x410   :  { %v1035_v17 = vadd.f32 %v987_v19, %v482_v26  ;;  %v1037_v35 = vadd.f32 %v1028_v16, %v484_v12  ;;  %v989_v27 = vpop.f32.mrb[41].mxu0  ;;  %v1030_v40 = vpop.f32.mrb[41].mxu1 }
 0x411   :  { %v1036_v22 = vadd.f32 %v989_v27, %v483_v33  ;;  %v1038_v39 = vadd.f32 %v1030_v40, %v485_v14  ;;  %v991_v20 = vpop.f32.mrb[42].mxu0  ;;  %v1032_v34 = vpop.f32.mrb[42].mxu1 }
 0x412   :  { %v1623_v23 = vmul.f32 -1.442695, %v1035_v17  ;;  %v992_v38 = vpop.f32.mrb[43].mxu0  ;;  %v1033_v18 = vpop.f32.mrb[43].mxu1  ;;  %v2573_v20 = vld [vmem:[#allocation23_spill] sm:$0xff] }
 0x413   :  { %v1624_v31 = vmul.f32 -1.442695, %v1036_v22  ;;  %v1625_v24 = vmul.f32 -1.442695, %v1038_v39  ;;  %v2572_v22 = vld [vmem:[#allocation19_spill] sm:$0xff]  ;;  %v489_v34 = vadd.f32 %v2181_v15, %v2573_v20 }
 0x414   :  { %1757 = vpow2.f32 %v1623_v23  ;;  %v487_v39 = vadd.f32 %v2045_v37, %v2572_v22 }
 0x415   :  { %1759 = vpow2.f32 %v1624_v31 }
 0x416   :  { %1761 = vpow2.f32 %v1625_v24 }
 0x417   :  { %1763 = vtanh.f32 %v1037_v35 }
 0x41e   :  { %v1758_v21 = vpop.eup %1757 }
 0x41f   :  { %v1760_v30 = vpop.eup %1759  ;;  %v1042_v36 = vadd.f32 1.0, %v1758_v21 }
 0x420   :  { %v1048_v41 = vadd.f32 1.0, %v1760_v30  ;;  %v1762_v26 = vpop.eup %1761 }
 0x421   :  { %1765 = vrcp.f32 %v1042_v36  ;;  %v1764_v11 = vpop.eup %1763  ;;  %v1055_v28 = vadd.f32 1.0, %v1762_v26 }
 0x422   :  { %1767 = vrcp.f32 %v1048_v41 }
 0x423   :  { %1769 = vrcp.f32 %v1055_v28 }
 0x42b   :  { %v1766_v12 = vpop.eup %1765 }
 0x42c   :  { %v1768_v32 = vpop.eup %1767  ;;  %v1059_v33 = vmul.f32 %v1766_v12, %v1764_v11 }
 0x42d   :  { %v1058_v14 = vmul.f32 %v1768_v32, %v2349_v0  ;;  %v1770_v16 = vpop.eup %1769  ;;  %v2571_v0 = vld [vmem:[#allocation21_spill] sm:$0xff] }
 0x42e   :  { %v488_v40 = vadd.f32 %v2199_v29, %v2571_v0 }
 0x42f   :  { %v2395_v19 = vadd.f32 %v1059_v33, %v1058_v14 }
 0x431   :  { %1771 = vtanh.f32 %v2395_v19 }
 0x43b   :  { %v1772_v17 = vpop.eup %1771 }
 0x43c   :  { %v1062_v27 = vmul.f32 %v1772_v17, %v1770_v16 }
 0x43e   :  { %v1063_v35 = vpack.c.bf16 %v1062_v27, %v1062_v27 }
 0x440   :  { %1097 = vmatmul.mubr.bf16.vlgmr.msra.gmra.mrb[44].mxu0 %v1063_v35  ;;  %1138 = vmatmul.mubr.bf16.vlgmr.msra.gmra.mrb[44].mxu1 %v1063_v35 }
 0x441   :  { %1176 = vmatpush1.bf16.msra.mxu0 %v2059_v44  ;;  %1217 = vmatpush1.bf16.msra.mxu1 %v2061_v45  ;;  %v2570_v44 = vld [vmem:[#allocation18_spill] sm:$0xff] }
 0x442   :  { %1177 = vmatprep.subr.bf16.mxu0 %v2068_v46  ;;  %1218 = vmatprep.subr.bf16.mxu1 %v2070_v47  ;;  %v486_v45 = vadd.f32 %v2176_v13, %v2570_v44 }
 0x443   :  { %1207 = vmatprep.mubr.bf16.mxu0 %v2551_v25  ;;  %1248 = vmatprep.mubr.bf16.mxu1 %v2551_v25 }
 0x445   :  { %1178 = vmatpush1.bf16.msra.mxu0 %v2073_v48  ;;  %1219 = vmatpush1.bf16.msra.mxu1 %v2075_v49 }
 0x446   :  { %1179 = vmatprep.subr.bf16.mxu0 %v2082_v50  ;;  %1220 = vmatprep.subr.bf16.mxu1 %v2084_v51 }
 0x449   :  { %1180 = vmatpush1.bf16.msra.mxu0 %v2086_v52  ;;  %1221 = vmatpush1.bf16.msra.mxu1 %v2088_v53 }
 0x44a   :  { %1181 = vmatprep.subr.bf16.mxu0 %v2096_v54  ;;  %1222 = vmatprep.subr.bf16.mxu1 %v2098_v55 }
 0x44d   :  { %1182 = vmatpush1.bf16.msra.mxu0 %v2101_v56  ;;  %1223 = vmatpush1.bf16.msra.mxu1 %v2103_v57 }
 0x44e   :  { %1183 = vmatprep.subr.bf16.mxu0 %v2111_v58  ;;  %1224 = vmatprep.subr.bf16.mxu1 %v2113_v59 }
 0x451   :  { %1184 = vmatpush1.bf16.msra.mxu0 %v2115_v60  ;;  %1225 = vmatpush1.bf16.msra.mxu1 %v2117_v61 }
 0x452   :  { %1185 = vmatprep.subr.bf16.mxu0 %v2125_v62  ;;  %1226 = vmatprep.subr.bf16.mxu1 %v2129_v1 }
 0x455   :  { %1186 = vmatpush1.bf16.msra.mxu0 %v2127_v63  ;;  %1227 = vmatpush1.bf16.msra.mxu1 %v2132_v2 }
 0x456   :  { %1187 = vmatprep.subr.bf16.mxu0 %v2137_v3  ;;  %1228 = vmatprep.subr.bf16.mxu1 %v2139_v4 }
 0x459   :  { %1188 = vmatpush1.bf16.msra.mxu0 %v2142_v5  ;;  %1229 = vmatpush1.bf16.msra.mxu1 %v2147_v6 }
 0x45a   :  { %1189 = vmatprep.subr.bf16.mxu0 %v2149_v7  ;;  %1230 = vmatprep.subr.bf16.mxu1 %v2153_v8 }
 0x45d   :  { %1190 = vmatpush1.bf16.msra.mxu0 %v2159_v9  ;;  %1231 = vmatpush1.bf16.msra.mxu1 %v2164_v10 }
 0x45e   :  { %1286 = vmatprep.subr.bf16.mxu0 %v2054_v42  ;;  %1327 = vmatprep.subr.bf16.mxu1 %v2056_v43 }
 0x513   :  { %v1098_v23 = vpop.f32.mrb[44].mxu0  ;;  %v1139_v38 = vpop.f32.mrb[44].mxu1 }
 0x514   :  { %v1146_v18 = vadd.f32 %v1098_v23, %v486_v45  ;;  %v1148_v31 = vadd.f32 %v1139_v38, %v488_v40  ;;  %v1100_v24 = vpop.f32.mrb[45].mxu0  ;;  %v1141_v42 = vpop.f32.mrb[45].mxu1  ;;  %v2444_v38 = vld [vmem:[#allocation5] ss:$16 sps:$4 sm:$0xff]  }
 0x515   :  { %v1147_v21 = vadd.f32 %v1100_v24, %v487_v39  ;;  %v1149_v43 = vadd.f32 %v1141_v42, %v489_v34  ;;  %v1102_v30 = vpop.f32.mrb[46].mxu0  ;;  %v1143_v36 = vpop.f32.mrb[46].mxu1 }
 0x516   :  { %v1626_v41 = vmul.f32 -1.442695, %v1146_v18  ;;  %v1103_v26 = vpop.f32.mrb[47].mxu0  ;;  %v1144_v11 = vpop.f32.mrb[47].mxu1  ;;  %v2447_v18 = vld [vmem:[#allocation5 + $0x8] ss:$16 sps:$4 sm:$0xff]  }
 0x517   :  { %v1627_v12 = vmul.f32 -1.442695, %v1147_v21  ;;  %v1628_v32 = vmul.f32 -1.442695, %v1149_v43 }
 0x518   :  { %1773 = vpow2.f32 %v1626_v41 }
 0x519   :  { %1775 = vpow2.f32 %v1627_v12 }
 0x51a   :  { %1777 = vpow2.f32 %v1628_v32 }
 0x51b   :  { %1779 = vtanh.f32 %v1148_v31 }
 0x522   :  { %v1774_v33 = vpop.eup %1773 }
 0x523   :  { %v1776_v28 = vpop.eup %1775  ;;  %v1153_v14 = vadd.f32 1.0, %v1774_v33  ;;  %v1841_v33 = vld [vmem:[#allocation5 + $0x24] ss:$16 sps:$4 sm:$0xff]  }
 0x524   :  { %v1159_v16 = vadd.f32 1.0, %v1776_v28  ;;  %v1778_v17 = vpop.eup %1777  ;;  %v1842_v28 = vld [vmem:[#allocation5 + $0x2c] ss:$16 sps:$4 sm:$0xff]  }
 0x525   :  { %1781 = vrcp.f32 %v1153_v14  ;;  %v1780_v27 = vpop.eup %1779  ;;  %v1166_v0 = vadd.f32 1.0, %v1778_v17  ;;  %v1843_v14 = vld [vmem:[#allocation5 + $0x20] ss:$16 sps:$4 sm:$0xff]   ;;  %v1845_v17 = vld [vmem:[#allocation5 + $0x44] ss:$16 sps:$4 sm:$0xff]  }
 0x526   :  { %1783 = vrcp.f32 %v1159_v16  ;;  %v1844_v16 = vld [vmem:[#allocation5 + $0x28] ss:$16 sps:$4 sm:$0xff]  }
 0x527   :  { %1785 = vrcp.f32 %v1166_v0  ;;  %v1850_v0 = vld [vmem:[#allocation5 + $0x6c] ss:$16 sps:$4 sm:$0xff]  }
 0x52f   :  { %v1782_v35 = vpop.eup %1781 }
 0x530   :  { %v1784_v44 = vpop.eup %1783  ;;  %v1170_v45 = vmul.f32 %v1782_v35, %v1780_v27  ;;  %v1846_v27 = vld [vmem:[#allocation5 + $0x4c] ss:$16 sps:$4 sm:$0xff]   ;;  %v1847_v35 = vld [vmem:[#allocation5 + $0x40] ss:$16 sps:$4 sm:$0xff]  }
 0x531   :  { %v1169_v40 = vmul.f32 %v1784_v44, %v2395_v19  ;;  %v1786_v39 = vpop.eup %1785  ;;  %v1848_v44 = vld [vmem:[#allocation5 + $0x48] ss:$16 sps:$4 sm:$0xff]  }
 0x533   :  { %v2441_v22 = vadd.f32 %v1170_v45, %v1169_v40  ;;  %v1849_v45 = vld [vmem:[#allocation5 + $0x64] ss:$16 sps:$4 sm:$0xff]   ;;  %v1851_v40 = vld [vmem:[#allocation5 + $0x60] ss:$16 sps:$4 sm:$0xff]  }
 0x535   :  { %1787 = vtanh.f32 %v2441_v22 }
 0x53f   :  { %v1788_v20 = vpop.eup %1787 }
 0x540   :  { %v1173_v34 = vmul.f32 %v1788_v20, %v1786_v39  ;;  %v1854_v39 = vld [vmem:[#allocation5 + $0x8c] ss:$16 sps:$4 sm:$0xff]   ;;  %v1855_v20 = vld [vmem:[#allocation5 + $0x80] ss:$16 sps:$4 sm:$0xff]  }
 0x542   :  { %v1174_v23 = vpack.c.bf16 %v1173_v34, %v1173_v34  ;;  %v1856_v34 = vld [vmem:[#allocation5 + $0x88] ss:$16 sps:$4 sm:$0xff]  }
 0x544   :  { %1208 = vmatmul.mubr.bf16.vlgmr.msra.gmra.mrb[48].mxu0 %v1174_v23  ;;  %1249 = vmatmul.mubr.bf16.vlgmr.msra.gmra.mrb[48].mxu1 %v1174_v23  ;;  %v1857_v23 = vld [vmem:[#allocation5 + $0xa4] ss:$16 sps:$4 sm:$0xff]  }
 0x545   :  { %1287 = vmatpush1.bf16.msra.mxu0 %v2444_v38  ;;  %1328 = vmatpush1.bf16.msra.mxu1 %v2447_v18 }
 0x546   :  { %1288 = vmatprep.subr.bf16.mxu0 %v2068_v46  ;;  %1329 = vmatprep.subr.bf16.mxu1 %v2070_v47  ;;  %v1839_v46 = vld [vmem:[#allocation5 + $0x4] ss:$16 sps:$4 sm:$0xff]   ;;  %v1840_v47 = vld [vmem:[#allocation5 + $0xc] ss:$16 sps:$4 sm:$0xff]  }
 0x547   :  { %1318 = vmatprep.mubr.bf16.mxu0 %v2551_v25  ;;  %1359 = vmatprep.mubr.bf16.mxu1 %v2551_v25 }
 0x549   :  { %1289 = vmatpush1.bf16.msra.mxu0 %v2073_v48  ;;  %1330 = vmatpush1.bf16.msra.mxu1 %v2075_v49  ;;  %v2574_v48 = vld [vmem:[#allocation20_spill] sm:$0xff] }
 0x54a   :  { %1290 = vmatprep.subr.bf16.mxu0 %v2082_v50  ;;  %1331 = vmatprep.subr.bf16.mxu1 %v2084_v51  ;;  %v490_v49 = vadd.f32 %v2176_v13, %v2574_v48  ;;  %v2575_v50 = vld [vmem:[#allocation24_spill] sm:$0xff]  ;;  %v1862_v48 = vld [vmem:[#allocation5 + $0xcc] ss:$16 sps:$4 sm:$0xff]  }
 0x54b   :  { %v492_v51 = vadd.f32 %v2199_v29, %v2575_v50  ;;  %v1864_v50 = vld [vmem:[#allocation5 + $0xc8] ss:$16 sps:$4 sm:$0xff]  }
 0x54d   :  { %1291 = vmatpush1.bf16.msra.mxu0 %v2086_v52  ;;  %1332 = vmatpush1.bf16.msra.mxu1 %v2088_v53  ;;  %v2576_v52 = vld [vmem:[#allocation22_spill] sm:$0xff] }
 0x54e   :  { %1292 = vmatprep.subr.bf16.mxu0 %v2096_v54  ;;  %1333 = vmatprep.subr.bf16.mxu1 %v2098_v55  ;;  %v491_v53 = vadd.f32 %v2045_v37, %v2576_v52  ;;  %v2577_v54 = vld [vmem:[#allocation25_spill] sm:$0xff] }
 0x54f   :  { %v493_v55 = vadd.f32 %v2181_v15, %v2577_v54  ;;  %v1866_v52 = vld [vmem:[#allocation5 + $0xec] ss:$16 sps:$4 sm:$0xff]   ;;  %v1868_v54 = vld [vmem:[#allocation5 + $0xe8] ss:$16 sps:$4 sm:$0xff]  }
 0x551   :  { %1293 = vmatpush1.bf16.msra.mxu0 %v2101_v56  ;;  %1334 = vmatpush1.bf16.msra.mxu1 %v2103_v57 }
 0x552   :  { %1294 = vmatprep.subr.bf16.mxu0 %v2111_v58  ;;  %1335 = vmatprep.subr.bf16.mxu1 %v2113_v59 }
 0x555   :  { %1295 = vmatpush1.bf16.msra.mxu0 %v2115_v60  ;;  %1336 = vmatpush1.bf16.msra.mxu1 %v2117_v61 }
 0x556   :  { %1296 = vmatprep.subr.bf16.mxu0 %v2125_v62  ;;  %1337 = vmatprep.subr.bf16.mxu1 %v2129_v1 }
 0x559   :  { %1297 = vmatpush1.bf16.msra.mxu0 %v2127_v63  ;;  %1338 = vmatpush1.bf16.msra.mxu1 %v2132_v2 }
 0x55a   :  { %1298 = vmatprep.subr.bf16.mxu0 %v2137_v3  ;;  %1339 = vmatprep.subr.bf16.mxu1 %v2139_v4 }
 0x55d   :  { %1299 = vmatpush1.bf16.msra.mxu0 %v2142_v5  ;;  %1340 = vmatpush1.bf16.msra.mxu1 %v2147_v6 }
 0x55e   :  { %1300 = vmatprep.subr.bf16.mxu0 %v2149_v7  ;;  %1341 = vmatprep.subr.bf16.mxu1 %v2153_v8 }
 0x561   :  { %1301 = vmatpush1.bf16.msra.mxu0 %v2159_v9  ;;  %1342 = vmatpush1.bf16.msra.mxu1 %v2164_v10 }
 0x562   :  { %1397 = vmatprep.subr.bf16.mxu0 %v1839_v46  ;;  %1438 = vmatprep.subr.bf16.mxu1 %v1840_v47  ;;  %v1860_v46 = vld [vmem:[#allocation5 + $0xa8] ss:$16 sps:$4 sm:$0xff]   ;;  %v1861_v47 = vld [vmem:[#allocation5 + $0xc4] ss:$16 sps:$4 sm:$0xff]  }
 0x617   :  { %v1209_v56 = vpop.f32.mrb[48].mxu0  ;;  %v1250_v57 = vpop.f32.mrb[48].mxu1 }
 0x618   :  { %v1257_v58 = vadd.f32 %v1209_v56, %v490_v49  ;;  %v1259_v59 = vadd.f32 %v1250_v57, %v492_v51  ;;  %v1211_v60 = vpop.f32.mrb[49].mxu0  ;;  %v1252_v61 = vpop.f32.mrb[49].mxu1  ;;  %v1863_v49 = vld [vmem:[#allocation5 + $0xc0] ss:$16 sps:$4 sm:$0xff]   ;;  %v1865_v51 = vld [vmem:[#allocation5 + $0xe4] ss:$16 sps:$4 sm:$0xff]  }
 0x619   :  { %v1258_v62 = vadd.f32 %v1211_v60, %v491_v53  ;;  %v1260_v63 = vadd.f32 %v1252_v61, %v493_v55  ;;  %v1213_v1 = vpop.f32.mrb[50].mxu0  ;;  %v1254_v2 = vpop.f32.mrb[50].mxu1  ;;  %v1867_v53 = vld [vmem:[#allocation5 + $0xe0] ss:$16 sps:$4 sm:$0xff]   ;;  %v2579_v57 = vld [vmem:[#allocation27_spill] sm:$0xff]  ;;  %v2581_v61 = vld [vmem:[#allocation29_spill] sm:$0xff] }
 0x61a   :  { %v1629_v3 = vmul.f32 -1.442695, %v1257_v58  ;;  %v1214_v4 = vpop.f32.mrb[51].mxu0  ;;  %v1255_v5 = vpop.f32.mrb[51].mxu1  ;;  %v2578_v55 = vld [vmem:[#allocation26_spill] sm:$0xff]  ;;  %v496_v58 = vadd.f32 %v2199_v29, %v2579_v57 }
 0x61b   :  { %v1630_v6 = vmul.f32 -1.442695, %v1258_v62  ;;  %v1631_v7 = vmul.f32 -1.442695, %v1260_v63  ;;  %v494_v56 = vadd.f32 %v2176_v13, %v2578_v55  ;;  %v497_v62 = vadd.f32 %v2181_v15, %v2581_v61 }
 0x61c   :  { %1789 = vpow2.f32 %v1629_v3 }
 0x61d   :  { %1791 = vpow2.f32 %v1630_v6 }
 0x61e   :  { %1793 = vpow2.f32 %v1631_v7 }
 0x61f   :  { %1795 = vtanh.f32 %v1259_v59  ;;  %v2580_v59 = vld [vmem:[#allocation28_spill] sm:$0xff] }
 0x620   :  { %v495_v60 = vadd.f32 %v2045_v37, %v2580_v59 }
 0x626   :  { %v1790_v8 = vpop.eup %1789 }
 0x627   :  { %v1792_v9 = vpop.eup %1791  ;;  %v1264_v10 = vadd.f32 1.0, %v1790_v8 }
 0x628   :  { %v1270_v19 = vadd.f32 1.0, %v1792_v9  ;;  %v1794_v31 = vpop.eup %1793 }
 0x629   :  { %1797 = vrcp.f32 %v1264_v10  ;;  %v1796_v24 = vpop.eup %1795  ;;  %v1277_v30 = vadd.f32 1.0, %v1794_v31 }
 0x62a   :  { %1799 = vrcp.f32 %v1270_v19 }
 0x62b   :  { %1801 = vrcp.f32 %v1277_v30 }
 0x633   :  { %v1798_v42 = vpop.eup %1797 }
 0x634   :  { %v1800_v21 = vpop.eup %1799  ;;  %v1281_v43 = vmul.f32 %v1798_v42, %v1796_v24 }
 0x635   :  { %v1280_v36 = vmul.f32 %v1800_v21, %v2441_v22  ;;  %v1802_v26 = vpop.eup %1801  ;;  %v1852_v22 = vld [vmem:[#allocation5 + $0x68] ss:$16 sps:$4 sm:$0xff]  }
 0x637   :  { %v2489_v41 = vadd.f32 %v1281_v43, %v1280_v36 }
 0x639   :  { %1803 = vtanh.f32 %v2489_v41 }
 0x643   :  { %v1804_v11 = vpop.eup %1803 }
 0x644   :  { %v1284_v12 = vmul.f32 %v1804_v11, %v1802_v26 }
 0x646   :  { %v1285_v32 = vpack.c.bf16 %v1284_v12, %v1284_v12 }
 0x648   :  { %1319 = vmatmul.mubr.bf16.vlgmr.msra.gmra.mrb[52].mxu0 %v1285_v32  ;;  %1360 = vmatmul.mubr.bf16.vlgmr.msra.gmra.mrb[52].mxu1 %v1285_v32 }
 0x649   :  { %1398 = vmatpush1.bf16.msra.mxu0 %v2444_v38  ;;  %1439 = vmatpush1.bf16.msra.mxu1 %v2447_v18  ;;  %v1858_v38 = vld [vmem:[#allocation5 + $0xac] ss:$16 sps:$4 sm:$0xff]   ;;  %v1859_v18 = vld [vmem:[#allocation5 + $0xa0] ss:$16 sps:$4 sm:$0xff]  }
 0x64a   :  { %1399 = vmatprep.subr.bf16.mxu0 %v1841_v33  ;;  %1440 = vmatprep.subr.bf16.mxu1 %v1842_v28 }
 0x64b   :  { %1429 = vmatprep.mubr.bf16.mxu0 %v2551_v25  ;;  %1470 = vmatprep.mubr.bf16.mxu1 %v2551_v25  ;;  %v1853_v25 = vld [vmem:[#allocation5 + $0x84] ss:$16 sps:$4 sm:$0xff]  }
 0x64d   :  { %1400 = vmatpush1.bf16.msra.mxu0 %v1843_v14  ;;  %1441 = vmatpush1.bf16.msra.mxu1 %v1844_v16 }
 0x64e   :  { %1401 = vmatprep.subr.bf16.mxu0 %v1845_v17  ;;  %1442 = vmatprep.subr.bf16.mxu1 %v1846_v27 }
 0x651   :  { %1402 = vmatpush1.bf16.msra.mxu0 %v1847_v35  ;;  %1443 = vmatpush1.bf16.msra.mxu1 %v1848_v44 }
 0x652   :  { %1403 = vmatprep.subr.bf16.mxu0 %v1849_v45  ;;  %1444 = vmatprep.subr.bf16.mxu1 %v1850_v0  ;;  %v2582_v45 = vld [vmem:[#allocation30_spill] sm:$0xff] }
 0x653   :  { %v498_v0 = vadd.f32 %v2176_v13, %v2582_v45 }
 0x655   :  { %1404 = vmatpush1.bf16.msra.mxu0 %v1851_v40  ;;  %1445 = vmatpush1.bf16.msra.mxu1 %v1852_v22  ;;  %v2583_v40 = vld [vmem:[#allocation31_spill] sm:$0xff] }
 0x656   :  { %1405 = vmatprep.subr.bf16.mxu0 %v1853_v25  ;;  %1446 = vmatprep.subr.bf16.mxu1 %v1854_v39  ;;  %v500_v22 = vadd.f32 %v2199_v29, %v2583_v40  ;;  %v2584_v25 = vld [vmem:[#allocation32_spill] sm:$0xff] }
 0x657   :  { %v499_v39 = vadd.f32 %v2045_v37, %v2584_v25 }
 0x659   :  { %1406 = vmatpush1.bf16.msra.mxu0 %v1855_v20  ;;  %1447 = vmatpush1.bf16.msra.mxu1 %v1856_v34  ;;  %v2585_v20 = vld [vmem:[#allocation33_spill] sm:$0xff] }
 0x65a   :  { %1407 = vmatprep.subr.bf16.mxu0 %v1857_v23  ;;  %1448 = vmatprep.subr.bf16.mxu1 %v1858_v38 }
 0x65d   :  { %1408 = vmatpush1.bf16.msra.mxu0 %v1859_v18  ;;  %1449 = vmatpush1.bf16.msra.mxu1 %v1860_v46 }
 0x65e   :  { %1409 = vmatprep.subr.bf16.mxu0 %v1861_v47  ;;  %1450 = vmatprep.subr.bf16.mxu1 %v1862_v48 }
 0x661   :  { %1410 = vmatpush1.bf16.msra.mxu0 %v1863_v49  ;;  %1451 = vmatpush1.bf16.msra.mxu1 %v1864_v50 }
 0x662   :  { %1411 = vmatprep.subr.bf16.mxu0 %v1865_v51  ;;  %1452 = vmatprep.subr.bf16.mxu1 %v1866_v52 }
 0x665   :  { %1412 = vmatpush1.bf16.msra.mxu0 %v1867_v53  ;;  %1453 = vmatpush1.bf16.msra.mxu1 %v1868_v54 }
 0x71b   :  { %v1320_v63 = vpop.f32.mrb[52].mxu0  ;;  %v1361_v1 = vpop.f32.mrb[52].mxu1 }
 0x71c   :  { %v1368_v2 = vadd.f32 %v1320_v63, %v494_v56  ;;  %v1370_v3 = vadd.f32 %v1361_v1, %v496_v58  ;;  %v1322_v4 = vpop.f32.mrb[53].mxu0  ;;  %v1363_v5 = vpop.f32.mrb[53].mxu1 }
 0x71d   :  { %v1369_v6 = vadd.f32 %v1322_v4, %v495_v60  ;;  %v1371_v7 = vadd.f32 %v1363_v5, %v497_v62  ;;  %v1324_v8 = vpop.f32.mrb[54].mxu0  ;;  %v1365_v9 = vpop.f32.mrb[54].mxu1 }
 0x71e   :  { %v1632_v10 = vmul.f32 -1.442695, %v1368_v2  ;;  %v1325_v19 = vpop.f32.mrb[55].mxu0  ;;  %v1366_v31 = vpop.f32.mrb[55].mxu1 }
 0x71f   :  { %v1633_v24 = vmul.f32 -1.442695, %v1369_v6  ;;  %v1634_v42 = vmul.f32 -1.442695, %v1371_v7  ;;  %v1527_v5 = vpop.permute.xlu0 %1526 }
 0x720   :  { %1805 = vpow2.f32 %v1632_v10 }
 0x721   :  { %1807 = vpow2.f32 %v1633_v24 }
 0x722   :  { %1809 = vpow2.f32 %v1634_v42 }
 0x723   :  { %1811 = vtanh.f32 %v1370_v3 }
 0x72a   :  { %v1806_v21 = vpop.eup %1805 }
 0x72b   :  { %v1808_v43 = vpop.eup %1807  ;;  %v1375_v30 = vadd.f32 1.0, %v1806_v21 }
 0x72c   :  { %v1381_v36 = vadd.f32 1.0, %v1808_v43  ;;  %v1810_v26 = vpop.eup %1809 }
 0x72d   :  { %1813 = vrcp.f32 %v1375_v30  ;;  %v1812_v11 = vpop.eup %1811  ;;  %v1388_v28 = vadd.f32 1.0, %v1810_v26 }
 0x72e   :  { %1815 = vrcp.f32 %v1381_v36 }
 0x72f   :  { %1817 = vrcp.f32 %v1388_v28 }
 0x737   :  { %v1814_v12 = vpop.eup %1813 }
 0x738   :  { %v1816_v32 = vpop.eup %1815  ;;  %v1392_v33 = vmul.f32 %v1814_v12, %v1812_v11 }
 0x739   :  { %v1391_v14 = vmul.f32 %v1816_v32, %v2489_v41  ;;  %v1818_v17 = vpop.eup %1817  ;;  %v501_v41 = vadd.f32 %v2181_v15, %v2585_v20 }
 0x73b   :  { %v1393_v16 = vadd.f32 %v1392_v33, %v1391_v14 }
 0x73d   :  { %1819 = vtanh.f32 %v1393_v16 }
 0x747   :  { %v1820_v27 = vpop.eup %1819 }
 0x748   :  { %v1395_v35 = vmul.f32 %v1820_v27, %v1818_v17 }
 0x74a   :  { %v1396_v44 = vpack.c.bf16 %v1395_v35, %v1395_v35 }
 0x74c   :  { %1430 = vmatmul.mubr.bf16.vlgmr.msra.gmra.mrb[56].mxu0 %v1396_v44  ;;  %1471 = vmatmul.mubr.bf16.vlgmr.msra.gmra.mrb[56].mxu1 %v1396_v44 }
 0x81f   :  { %v1431_v34 = vpop.f32.mrb[56].mxu0  ;;  %v1472_v23 = vpop.f32.mrb[56].mxu1 }
 0x820   :  { %v1479_v38 = vadd.f32 %v1431_v34, %v498_v0  ;;  %v1481_v18 = vadd.f32 %v1472_v23, %v500_v22  ;;  %v1433_v46 = vpop.f32.mrb[57].mxu0  ;;  %v1474_v47 = vpop.f32.mrb[57].mxu1 }
 0x821   :  { %v1480_v48 = vadd.f32 %v1433_v46, %v499_v39  ;;  %v1482_v49 = vadd.f32 %v1474_v47, %v501_v41  ;;  %v1435_v50 = vpop.f32.mrb[58].mxu0  ;;  %v1476_v51 = vpop.f32.mrb[58].mxu1 }
 0x822   :  { %v1635_v13 = vmul.f32 -1.442695, %v1479_v38  ;;  %v1436_v52 = vpop.f32.mrb[59].mxu0  ;;  %v1477_v53 = vpop.f32.mrb[59].mxu1 }
 0x823   :  { %v1636_v29 = vmul.f32 -1.442695, %v1480_v48  ;;  %v1637_v37 = vmul.f32 -1.442695, %v1482_v49 }
 0x824   :  { %1821 = vpow2.f32 %v1635_v13 }
 0x825   :  { %1823 = vpow2.f32 %v1636_v29 }
 0x826   :  { %1825 = vpow2.f32 %v1637_v37 }
 0x827   :  { %1827 = vtanh.f32 %v1481_v18 }
 0x82e   :  { %v1822_v54 = vpop.eup %1821 }
 0x82f   :  { %v1824_v55 = vpop.eup %1823  ;;  %v1486_v15 = vadd.f32 1.0, %v1822_v54 }
 0x830   :  { %v1492_v56 = vadd.f32 1.0, %v1824_v55  ;;  %v1826_v57 = vpop.eup %1825 }
 0x831   :  { %1829 = vrcp.f32 %v1486_v15  ;;  %v1828_v58 = vpop.eup %1827  ;;  %v1499_v62 = vadd.f32 1.0, %v1826_v57 }
 0x832   :  { %1831 = vrcp.f32 %v1492_v56 }
 0x833   :  { %1833 = vrcp.f32 %v1499_v62 }
 0x83b   :  { %v1830_v59 = vpop.eup %1829 }
 0x83c   :  { %v1832_v60 = vpop.eup %1831  ;;  %v1503_v61 = vmul.f32 %v1830_v59, %v1828_v58 }
 0x83d   :  { %v1502_v63 = vmul.f32 %v1832_v60, %v1393_v16  ;;  %v1834_v2 = vpop.eup %1833 }
 0x83f   :  { %v1504_v1 = vadd.f32 %v1503_v61, %v1502_v63 }
 0x841   :  { %1835 = vtanh.f32 %v1504_v1 }
 0x84b   :  { %v1836_v3 = vpop.eup %1835 }
 0x84c   :  { %v1506_v4 = vmul.f32 %v1836_v3, %v1834_v2 }
 0x84e   :  { %1524 = vst.msk [vmem:[#allocation7] sm:$0xff] %vm1523_vm1, %v1506_v4 }
 0x84f   :  { %1530 = vst.msk [vmem:[#allocation7] sm:$0xff] %vm1529_vm2, %v1527_v5 }
 0x850   :  { %1924 = shalt.err (!%p1921_p6)
}
 0x851   :  { %s1925_s9 = scalar_lea.hbm %s2530_s5, 128 }
 0x852   :  { %p1926_p7 = scmp.ne.s32.totalorder %s2530_s5, %s1925_s9  ;;  %p1929_p8 = scmp.lt.u32.totalorder %s1925_s9, %s2530_s5 }
 0x854   :  { %p1931_p9 = pnand %p1929_p8, %p1926_p7 }
 0x856   :  { %1934 = shalt.err (!%p1931_p9)
}
 0x857   :  { %1540 = dma.vmem_to_hbm [thread:$0]  %s1538_s30, 128, %s2530_s5, [#allocation4]  }
 0x858   :  { %1939 = dma.done.wait [#allocation4], 128  }
 0x859   :  { %1940 = vsyncadd [#allocation4], 4294967168 }
 0x85a   :  { %1544 = vsyncpa [#allocation3], 1 }
 0x85b   :  { %1545 = vsyncpa [#allocation6], 1 }
 0x85c   :  { %1546 = vsyncpa [#allocation4], 1 }

</bundles_post_ra>
